<compile_context>
chip_gen: v7x
topology: tpu7x:2x2x1
jax: 0.10.0
libtpu: 0.0.40
codegen_flags: <defaults>
</compile_context>

<pallas_src>
import functools

import jax
import jax.numpy as jnp
from jax.experimental import pallas as pl
from jax.experimental.pallas import tpu as pltpu


# ----------------------------------------------------------------------------
# helpers
# ----------------------------------------------------------------------------
def _round_up(n, m):
    return (n + m - 1) // m * m


def _pad2(a, rows, cols):
    return jnp.pad(a, ((0, rows - a.shape[0]), (0, cols - a.shape[1])))


def _pad1(a, n):
    return jnp.pad(a, (0, n - a.shape[0]))


def _vmem_capacity_bytes():
    try:
        return int(pltpu.get_tpu_info().vmem_capacity_bytes)
    except Exception:
        return 64 * 1024 * 1024  # conservative (v7x per-TensorCore)


def _vmem_limit_bytes(footprint):
    """Scoped-VMEM budget: ~2x the static block footprint, clamped to capacity."""
    cap = _vmem_capacity_bytes()
    want = int(footprint) * 2 + (4 << 20)
    want = max(want, 32 << 20)
    return int(min(want, int(cap * 0.9), 128 << 20))


def _pick_row_tile(mp, vmem_cap):
    # Largest 128-aligned tile that (a) respects the generation's VMEM
    # (v7x has 64 MiB/TC -> cap tm at 256) and (b) gives an EVEN number of
    # row blocks so the "parallel" axis splits cleanly across 2 TensorCores.
    tm_max = 512 if vmem_cap >= (100 << 20) else 256
    cands = [t for t in (512, 256, 128) if t <= tm_max and mp % t == 0]
    for t in cands:                      # prefer even block count
        if (mp // t) % 2 == 0:
            return t
    for t in cands:                      # else any multi-block tile
        if mp // t >= 2:
            return t
    return mp


def _pick_contract_tile(mp):
    for t in (512, 256, 128):
        if mp % t == 0:
            return t
    return mp


def _const_block_spec(shape, grid_ndim):
    """Block with a constant index_map (fetched once), single-buffered."""
    zeros = (0,) * len(shape)
    if grid_ndim == 1:
        index_map = lambda i: zeros
    else:
        index_map = lambda i, k: zeros
    try:
        return pl.BlockSpec(shape, index_map, pipeline_mode=pl.Buffered(1))
    except (AttributeError, TypeError):
        # Older jax without pipeline_mode / Buffered: fall back to default.
        return pl.BlockSpec(shape, index_map)


# ----------------------------------------------------------------------------
# Kernel 1: P = X @ W1
#   grid over row blocks only; W1 fully VMEM-resident (constant index_map).
# ----------------------------------------------------------------------------
def _project_kernel(x_ref, w_ref, o_ref):
    o_ref[...] = jnp.dot(
        x_ref[...], w_ref[...], preferred_element_type=jnp.float32
    ).astype(o_ref.dtype)


def _project(x_p, w1_p, *, tm):
    Mp, Fp = x_p.shape
    Hp = w1_p.shape[1]
    footprint = (
        2 * tm * Fp * 2        # X block double-buffered (bf16)
        + 2 * Fp * Hp * 2      # W1 (budgeted at 2x in case Buffered(1) is unavailable)
        + 2 * tm * Hp * 2      # output double-buffered (bf16)
        + tm * Hp * 4          # f32 intermediate
    )
    return pl.pallas_call(
        _project_kernel,
        out_shape=jax.ShapeDtypeStruct((Mp, Hp), jnp.bfloat16),
        grid_spec=pltpu.PrefetchScalarGridSpec(
            num_scalar_prefetch=0,
            grid=(Mp // tm,),
            in_specs=[
                pl.BlockSpec((tm, Fp), lambda i: (i, 0)),   # X row block
                _const_block_spec((Fp, Hp), 1),             # W1, resident
            ],
            out_specs=pl.BlockSpec((tm, Hp), lambda i: (i, 0)),
        ),
        compiler_params=pltpu.CompilerParams(
            dimension_semantics=("parallel",),
            vmem_limit_bytes=_vmem_limit_bytes(footprint),
        ),
    )(x_p, w1_p)


# ----------------------------------------------------------------------------
# Kernel 2: fused  relu(A@P + b1) -> N x relu(.@Wh + bh) -> relu(.@W2 + b2)
#   grid = (row blocks of A, K blocks of the A@P contraction)
# ----------------------------------------------------------------------------
def _gcn_fused_kernel(a_ref, p_ref, b1_ref, wh_ref, bh_ref, w2_ref, b2_ref,
                      o_ref, acc_ref, *, n_hidden_layers):
    k = pl.program_id(1)

    @pl.when(k == 0)
    def _():
        acc_ref[...] = jnp.zeros_like(acc_ref)

    # K-tiled fc1 contraction: acc += A_block @ P_block  (bf16 x bf16 -> f32)
    acc_ref[...] += jnp.dot(
        a_ref[...], p_ref[...], preferred_element_type=jnp.float32
    )

    @pl.when(k == pl.num_programs(1) - 1)
    def _():
        # Hoisted loads (JAX does not CSE repeated ref loads / broadcasts).
        b1 = b1_ref[...]
        bh = bh_ref[...]
        b2 = b2_ref[...]
        wh = wh_ref[...]

        # fc1 bias + ReLU; carry the activation in bf16 between layers
        # (next matmul consumes bf16; accumulation stays f32).
        h = jnp.maximum(acc_ref[...] + b1, 0.0).astype(jnp.bfloat16)

        # N hidden layers (same weights each iteration, as in the module).
        # n_hidden_layers is a static Python int -> unrolled at trace time.
        for _ in range(n_hidden_layers):
            t = jnp.dot(h, wh, preferred_element_type=jnp.float32)
            h = jnp.maximum(t + bh, 0.0).astype(jnp.bfloat16)

        # fc2 + ReLU (module applies ReLU on the classifier output too),
        # written as a lane-dense (tm, Cp) slab.
        y = jnp.dot(h, w2_ref[...], preferred_element_type=jnp.float32)
        o_ref[...] = jnp.maximum(y + b2, 0.0)


def _gcn_fused(A_p, P, b1_p, wh_p, bh_p, w2_p, b2_p, n_hidden_layers, *,
               tm, tka):
    Mp = A_p.shape[0]
    Hp = wh_p.shape[0]
    Cp = w2_p.shape[1]

    footprint = (
        2 * tm * tka * 2                     # A block double-buffered (bf16)
        + 2 * tka * Hp * 2                   # P block double-buffered (bf16)
        + 2 * (Hp * Hp + Hp * Cp) * 2        # Wh, W2 (2x budget in case of fallback)
        + 2 * (3 * Hp + Cp) * 4              # biases
        + tm * Hp * 4                        # f32 accumulator scratch
        + 2 * tm * Cp * 4                    # output double-buffered (f32)
        + 2 * tm * Hp * 4 + tm * Hp * 2      # live activation intermediates
    )

    kernel = functools.partial(_gcn_fused_kernel,
                               n_hidden_layers=n_hidden_layers)
    return pl.pallas_call(
        kernel,
        out_shape=jax.ShapeDtypeStruct((Mp, Cp), jnp.float32),
        grid_spec=pltpu.PrefetchScalarGridSpec(
            num_scalar_prefetch=0,
            grid=(Mp // tm, Mp // tka),
            in_specs=[
                pl.BlockSpec((tm, tka), lambda i, k: (i, k)),   # A block
                pl.BlockSpec((tka, Hp), lambda i, k: (k, 0)),   # P K-block
                _const_block_spec((1, Hp), 2),                  # b1
                _const_block_spec((Hp, Hp), 2),                 # Wh
                _const_block_spec((1, Hp), 2),                  # bh
                _const_block_spec((Hp, Cp), 2),                 # W2
                _const_block_spec((1, Cp), 2),                  # b2
            ],
            out_specs=pl.BlockSpec((tm, Cp), lambda i, k: (i, 0)),
            scratch_shapes=[pltpu.VMEM((tm, Hp), jnp.float32)],
        ),
        compiler_params=pltpu.CompilerParams(
            dimension_semantics=("parallel", "arbitrary"),
            vmem_limit_bytes=_vmem_limit_bytes(footprint),
        ),
    )(A_p, P, b1_p, wh_p, bh_p, w2_p, b2_p)


# ----------------------------------------------------------------------------
# GCN_N_layer forward (weights stored as (in, out) = W^T of nn.Linear)
# ----------------------------------------------------------------------------
def gcn_n_layer_forward(A, x, params, n_hidden_layers):
    f32, bf = jnp.float32, jnp.bfloat16
    M, F = x.shape
    H = params["w1"].shape[1]
    C = params["w2"].shape[1]

    # Zero-pad everything to 128 multiples (lane-dense, tile-aligned).
    Mp = _round_up(M, 128)
    Fp = _round_up(F, 128)
    Hp = _round_up(H, 128)
    Cp = _round_up(C, 128)

    A_p = _pad2(A.astype(f32), Mp, Mp).astype(bf)
    x_p = _pad2(x.astype(f32), Mp, Fp).astype(bf)
    w1_p = _pad2(params["w1"].astype(f32), Fp, Hp).astype(bf)
    wh_p = _pad2(params["wh"].astype(f32), Hp, Hp).astype(bf)
    w2_p = _pad2(params["w2"].astype(f32), Hp, Cp).astype(bf)
    b1_p = _pad1(params["b1"].astype(f32), Hp).reshape(1, Hp)
    bh_p = _pad1(params["bh"].astype(f32), Hp).reshape(1, Hp)
    b2_p = _pad1(params["b2"].astype(f32), Cp).reshape(1, Cp)

    vmem_cap = _vmem_capacity_bytes()
    tm = _pick_row_tile(Mp, vmem_cap)
    tka = _pick_contract_tile(Mp)

    # Reassociation: (A @ X) @ W1 == A @ (X @ W1); project features first.
    P = _project(x_p, w1_p, tm=tm)                                  # (Mp, Hp) bf16

    # fc1 bias+relu, N hidden layers, fc2+relu — one fused kernel.
    out_p = _gcn_fused(A_p, P, b1_p, wh_p, bh_p, w2_p, b2_p,
                       n_hidden_layers, tm=tm, tka=tka)             # (Mp, Cp) f32
    return out_p[:M, :C]


# ----------------------------------------------------------------------------
# Pure-JAX references
# ----------------------------------------------------------------------------
def gcn_n_layer_ref(A, x, params, n_hidden_layers, emulate_bf16=False):
    f32, bf = jnp.float32, jnp.bfloat16
    if emulate_bf16:
        # Matches the kernel's numerics: bf16 operands, f32 accumulation,
        # reassociated A @ (X @ W1), P stored in bf16.
        def mm(a, b):
            return jnp.dot(a.astype(bf), b.astype(bf),
                           preferred_element_type=f32)
        P = mm(x.astype(f32), params["w1"]).astype(bf)
        h = jnp.maximum(mm(A.astype(f32), P) + params["b1"], 0.0)
    else:
        # Module-order f32 math: ((A @ x) @ W1 + b1) etc.
        def mm(a, b):
            return a @ b
        x0 = x.astype(f32)
        h = jnp.maximum((A.astype(f32) @ x0) @ params["w1"] + params["b1"], 0.0)
    for _ in range(n_hidden_layers):
        h = jnp.maximum(mm(h, params["wh"]) + params["bh"], 0.0)
    h = jnp.maximum(mm(h, params["w2"]) + params["b2"], 0.0)
    return h


if __name__ == "__main__":
    # Small shapes consistent with the module (F=1433, H=200, C=7 scaled down),
    # deliberately NOT 128-aligned so the padding path is exercised.
    num_nodes = 200
    f_in = 300
    hidden = 200
    classes = 7
    n_layers = 2

    key = jax.random.PRNGKey(0)
    k_a, k_x, k_w1, k_b1, k_wh, k_bh, k_w2, k_b2 = jax.random.split(key, 8)

    A = jax.random.normal(k_a, (num_nodes, num_nodes), jnp.float32) * 0.1
    x = jax.random.normal(k_x, (num_nodes, f_in), jnp.float32)

    # Weights stored as (in, out) = transpose of nn.Linear's weight.
    params = {
        "w1": jax.random.normal(k_w1, (f_in, hidden), jnp.float32) * 0.05,
        "b1": jax.random.normal(k_b1, (hidden,), jnp.float32) * 0.05,
        "wh": jax.random.normal(k_wh, (hidden, hidden), jnp.float32) * 0.05,
        "bh": jax.random.normal(k_bh, (hidden,), jnp.float32) * 0.05,
        "w2": jax.random.normal(k_w2, (hidden, classes), jnp.float32) * 0.05,
        "b2": jax.random.normal(k_b2, (classes,), jnp.float32) * 0.05,
    }

    fwd = jax.jit(functools.partial(gcn_n_layer_forward,
                                    n_hidden_layers=n_layers))
    out = jax.block_until_ready(fwd(A, x, params))
    assert out.shape == (num_nodes, classes)
    assert bool(jnp.all(jnp.isfinite(out)))

    # Tight check vs a reference that matches the kernel's bf16/f32 numerics
    # (residual differences are only f32 accumulation ordering).
    ref_bf16 = gcn_n_layer_ref(A, x, params, n_layers, emulate_bf16=True)
    assert jnp.allclose(out, ref_bf16, atol=1e-2, rtol=1e-2), \
        "mismatch vs bf16-matched reference"

    # Loose check vs the pure-f32 module-order reference (bf16 MXU operands
    # introduce small, expected deltas).
    ref_f32 = gcn_n_layer_ref(A, x, params, n_layers, emulate_bf16=False)
    assert jnp.allclose(out, ref_f32, atol=1.5e-1, rtol=1.5e-1), \
        "mismatch vs f32 reference"

    print("KERNEL_OK")
</pallas_src>

<mosaic_0001>
module attributes {stable_mosaic.version = 11 : i64} {
  func.func @_project_kernel(%arg0: i32, %arg1: memref<128x384xbf16, #tpu.memory_space<vmem>>, %arg2: memref<384x256xbf16, #tpu.memory_space<vmem>>, %arg3: memref<128x256xbf16, #tpu.memory_space<vmem>>) attributes {dimension_semantics = [#tpu.dimension_semantics<parallel>], iteration_bounds = array<i64: 2>, scalar_prefetch = 0 : i64, scratch_operands = 0 : i64, tpu.core_type = #tpu.core_type<tc>, window_params = [{transform_indices = @transform_0, window_bounds = array<i64: 128, 384>}, {pipeline_mode = #tpu.pipeline_mode<synchronous>, transform_indices = @transform_1, window_bounds = array<i64: 384, 256>}, {transform_indices = @transform_2, window_bounds = array<i64: 128, 256>}]} {
    %c0 = arith.constant 0 : index
    %c0_0 = arith.constant 0 : index
    %0 = vector.load %arg1[%c0, %c0_0] : memref<128x384xbf16, #tpu.memory_space<vmem>>, vector<128x384xbf16>
    %c0_1 = arith.constant 0 : index
    %c0_2 = arith.constant 0 : index
    %1 = vector.load %arg2[%c0_1, %c0_2] : memref<384x256xbf16, #tpu.memory_space<vmem>>, vector<384x256xbf16>
    %cst = arith.constant dense<0.000000e+00> : vector<128x256xf32>
    %2 = tpu.matmul %0, %1, %cst {dimension_numbers = #tpu.dot_dimension_numbers<[1], [0], [0], [1], [0, 0, 1, 1], [], []>} : vector<128x384xbf16>, vector<384x256xbf16>, vector<128x256xf32> -> vector<128x256xf32>
    %3 = arith.truncf %2 : vector<128x256xf32> to vector<128x256xbf16>
    %c0_3 = arith.constant 0 : index
    %c0_4 = arith.constant 0 : index
    %4 = vector.load %arg3[%c0_3, %c0_4] : memref<128x256xbf16, #tpu.memory_space<vmem>>, vector<128x256xbf16>
    tpu.vector_store %arg3[%c0_3, %c0_4], %3 {strides = array<i32>} : memref<128x256xbf16, #tpu.memory_space<vmem>>, vector<128x256xbf16>,
    return
  }
  func.func @transform_0(%arg0: i32) -> (i32, i32) {
    %c0_i32 = arith.constant 0 : i32
    %c0_i32_0 = arith.constant 0 : i32
    return %arg0, %c0_i32 : i32, i32
  }
  func.func @transform_1(%arg0: i32) -> (i32, i32) {
    %c0_i32 = arith.constant 0 : i32
    %c0_i32_0 = arith.constant 0 : i32
    %c0_i32_1 = arith.constant 0 : i32
    return %c0_i32, %c0_i32_0 : i32, i32
  }
  func.func @transform_2(%arg0: i32) -> (i32, i32) {
    %c0_i32 = arith.constant 0 : i32
    %c0_i32_0 = arith.constant 0 : i32
    return %arg0, %c0_i32 : i32, i32
  }
}

module attributes {stable_mosaic.version = 11 : i64} {
  func.func @_gcn_fused_kernel(%arg0: i32, %arg1: i32, %arg2: memref<128x256xbf16, #tpu.memory_space<vmem>>, %arg3: memref<256x256xbf16, #tpu.memory_space<vmem>>, %arg4: memref<1x256xf32, #tpu.memory_space<vmem>>, %arg5: memref<256x256xbf16, #tpu.memory_space<vmem>>, %arg6: memref<1x256xf32, #tpu.memory_space<vmem>>, %arg7: memref<256x128xbf16, #tpu.memory_space<vmem>>, %arg8: memref<1x128xf32, #tpu.memory_space<vmem>>, %arg9: memref<128x128xf32, #tpu.memory_space<vmem>>, %arg10: memref<128x256xf32, #tpu.memory_space<vmem>>) attributes {dimension_semantics = [#tpu.dimension_semantics<parallel>, #tpu.dimension_semantics<arbitrary>], iteration_bounds = array<i64: 2, 1>, scalar_prefetch = 0 : i64, scratch_operands = 1 : i64, tpu.core_type = #tpu.core_type<tc>, window_params = [{transform_indices = @transform_0, window_bounds = array<i64: 128, 256>}, {transform_indices = @transform_1, window_bounds = array<i64: 256, 256>}, {pipeline_mode = #tpu.pipeline_mode<synchronous>, transform_indices = @transform_2, window_bounds = array<i64: 1, 256>}, {pipeline_mode = #tpu.pipeline_mode<synchronous>, transform_indices = @transform_3, window_bounds = array<i64: 256, 256>}, {pipeline_mode = #tpu.pipeline_mode<synchronous>, transform_indices = @transform_4, window_bounds = array<i64: 1, 256>}, {pipeline_mode = #tpu.pipeline_mode<synchronous>, transform_indices = @transform_5, window_bounds = array<i64: 256, 128>}, {pipeline_mode = #tpu.pipeline_mode<synchronous>, transform_indices = @transform_6, window_bounds = array<i64: 1, 128>}, {transform_indices = @transform_7, window_bounds = array<i64: 128, 128>}]} {
    %c0_i32 = arith.constant 0 : i32
    %0 = arith.cmpi eq, %arg1, %c0_i32 : i32
    %1 = arith.extui %0 : i1 to i32
    %c0_i32_0 = arith.constant 0 : i32
    %2 = arith.cmpi ne, %1, %c0_i32_0 : i32
    scf.if %2 {
      %cst_10 = arith.constant 0.000000e+00 : f32
      %12 = vector.broadcast %cst_10 : f32 to vector<128x256xf32>
      %c0_11 = arith.constant 0 : index
      %c0_12 = arith.constant 0 : index
      %13 = vector.load %arg10[%c0_11, %c0_12] : memref<128x256xf32, #tpu.memory_space<vmem>>, vector<128x256xf32>
      tpu.vector_store %arg10[%c0_11, %c0_12], %12 {strides = array<i32>} : memref<128x256xf32, #tpu.memory_space<vmem>>, vector<128x256xf32>,
    } else {
    }
    %c0 = arith.constant 0 : index
    %c0_1 = arith.constant 0 : index
    %3 = vector.load %arg10[%c0, %c0_1] : memref<128x256xf32, #tpu.memory_space<vmem>>, vector<128x256xf32>
    %c0_2 = arith.constant 0 : index
    %c0_3 = arith.constant 0 : index
    %4 = vector.load %arg2[%c0_2, %c0_3] : memref<128x256xbf16, #tpu.memory_space<vmem>>, vector<128x256xbf16>
    %c0_4 = arith.constant 0 : index
    %c0_5 = arith.constant 0 : index
    %5 = vector.load %arg3[%c0_4, %c0_5] : memref<256x256xbf16, #tpu.memory_space<vmem>>, vector<256x256xbf16>
    %cst = arith.constant dense<0.000000e+00> : vector<128x256xf32>
    %6 = tpu.matmul %4, %5, %cst {dimension_numbers = #tpu.dot_dimension_numbers<[1], [0], [0], [1], [0, 0, 1, 1], [], []>} : vector<128x256xbf16>, vector<256x256xbf16>, vector<128x256xf32> -> vector<128x256xf32>
    %7 = arith.addf %3, %6 : vector<128x256xf32>
    %c0_6 = arith.constant 0 : index
    %c0_7 = arith.constant 0 : index
    %8 = vector.load %arg10[%c0_6, %c0_7] : memref<128x256xf32, #tpu.memory_space<vmem>>, vector<128x256xf32>
    tpu.vector_store %arg10[%c0_6, %c0_7], %7 {strides = array<i32>} : memref<128x256xf32, #tpu.memory_space<vmem>>, vector<128x256xf32>,
    %c0_i32_8 = arith.constant 0 : i32
    %9 = arith.cmpi eq, %arg1, %c0_i32_8 : i32
    %10 = arith.extui %9 : i1 to i32
    %c0_i32_9 = arith.constant 0 : i32
    %11 = arith.cmpi ne, %10, %c0_i32_9 : i32
    scf.if %11 {
      %c0_10 = arith.constant 0 : index
      %c0_11 = arith.constant 0 : index
      %12 = vector.load %arg4[%c0_10, %c0_11] : memref<1x256xf32, #tpu.memory_space<vmem>>, vector<1x256xf32>
      %c0_12 = arith.constant 0 : index
      %c0_13 = arith.constant 0 : index
      %13 = vector.load %arg6[%c0_12, %c0_13] : memref<1x256xf32, #tpu.memory_space<vmem>>, vector<1x256xf32>
      %c0_14 = arith.constant 0 : index
      %c0_15 = arith.constant 0 : index
      %14 = vector.load %arg8[%c0_14, %c0_15] : memref<1x128xf32, #tpu.memory_space<vmem>>, vector<1x128xf32>
      %c0_16 = arith.constant 0 : index
      %c0_17 = arith.constant 0 : index
      %15 = vector.load %arg5[%c0_16, %c0_17] : memref<256x256xbf16, #tpu.memory_space<vmem>>, vector<256x256xbf16>
      %c0_18 = arith.constant 0 : index
      %c0_19 = arith.constant 0 : index
      %16 = vector.load %arg10[%c0_18, %c0_19] : memref<128x256xf32, #tpu.memory_space<vmem>>, vector<128x256xf32>
      %17 = vector.broadcast %12 : vector<1x256xf32> to vector<128x256xf32>
      %18 = arith.addf %16, %17 : vector<128x256xf32>
      %cst_20 = arith.constant 0.000000e+00 : f32
      %19 = vector.broadcast %cst_20 : f32 to vector<128x256xf32>
      %20 = arith.maximumf %18, %19 : vector<128x256xf32>
      %21 = arith.truncf %20 : vector<128x256xf32> to vector<128x256xbf16>
      %cst_21 = arith.constant dense<0.000000e+00> : vector<128x256xf32>
      %22 = tpu.matmul %21, %15, %cst_21 {dimension_numbers = #tpu.dot_dimension_numbers<[1], [0], [0], [1], [0, 0, 1, 1], [], []>} : vector<128x256xbf16>, vector<256x256xbf16>, vector<128x256xf32> -> vector<128x256xf32>
      %23 = vector.broadcast %13 : vector<1x256xf32> to vector<128x256xf32>
      %24 = arith.addf %22, %23 : vector<128x256xf32>
      %cst_22 = arith.constant 0.000000e+00 : f32
      %25 = vector.broadcast %cst_22 : f32 to vector<128x256xf32>
      %26 = arith.maximumf %24, %25 : vector<128x256xf32>
      %27 = arith.truncf %26 : vector<128x256xf32> to vector<128x256xbf16>
      %cst_23 = arith.constant dense<0.000000e+00> : vector<128x256xf32>
      %28 = tpu.matmul %27, %15, %cst_23 {dimension_numbers = #tpu.dot_dimension_numbers<[1], [0], [0], [1], [0, 0, 1, 1], [], []>} : vector<128x256xbf16>, vector<256x256xbf16>, vector<128x256xf32> -> vector<128x256xf32>
      %29 = vector.broadcast %13 : vector<1x256xf32> to vector<128x256xf32>
      %30 = arith.addf %28, %29 : vector<128x256xf32>
      %cst_24 = arith.constant 0.000000e+00 : f32
      %31 = vector.broadcast %cst_24 : f32 to vector<128x256xf32>
      %32 = arith.maximumf %30, %31 : vector<128x256xf32>
      %33 = arith.truncf %32 : vector<128x256xf32> to vector<128x256xbf16>
      %c0_25 = arith.constant 0 : index
      %c0_26 = arith.constant 0 : index
      %34 = vector.load %arg7[%c0_25, %c0_26] : memref<256x128xbf16, #tpu.memory_space<vmem>>, vector<256x128xbf16>
      %cst_27 = arith.constant dense<0.000000e+00> : vector<128x128xf32>
      %35 = tpu.matmul %33, %34, %cst_27 {dimension_numbers = #tpu.dot_dimension_numbers<[1], [0], [0], [1], [0, 0, 1, 1], [], []>} : vector<128x256xbf16>, vector<256x128xbf16>, vector<128x128xf32> -> vector<128x128xf32>
      %36 = vector.broadcast %14 : vector<1x128xf32> to vector<128x128xf32>
      %37 = arith.addf %35, %36 : vector<128x128xf32>
      %cst_28 = arith.constant 0.000000e+00 : f32
      %38 = vector.broadcast %cst_28 : f32 to vector<128x128xf32>
      %39 = arith.maximumf %37, %38 : vector<128x128xf32>
      %c0_29 = arith.constant 0 : index
      %c0_30 = arith.constant 0 : index
      %40 = vector.load %arg9[%c0_29, %c0_30] : memref<128x128xf32, #tpu.memory_space<vmem>>, vector<128x128xf32>
      tpu.vector_store %arg9[%c0_29, %c0_30], %39 {strides = array<i32>} : memref<128x128xf32, #tpu.memory_space<vmem>>, vector<128x128xf32>,
    } else {
    }
    return
  }
  func.func @transform_0(%arg0: i32, %arg1: i32) -> (i32, i32) {
    %c0_i32 = arith.constant 0 : i32
    return %arg0, %arg1 : i32, i32
  }
  func.func @transform_1(%arg0: i32, %arg1: i32) -> (i32, i32) {
    %c0_i32 = arith.constant 0 : i32
    %c0_i32_0 = arith.constant 0 : i32
    return %arg1, %c0_i32 : i32, i32
  }
  func.func @transform_2(%arg0: i32, %arg1: i32) -> (i32, i32) {
    %c0_i32 = arith.constant 0 : i32
    %c0_i32_0 = arith.constant 0 : i32
    %c0_i32_1 = arith.constant 0 : i32
    return %c0_i32, %c0_i32_0 : i32, i32
  }
  func.func @transform_3(%arg0: i32, %arg1: i32) -> (i32, i32) {
    %c0_i32 = arith.constant 0 : i32
    %c0_i32_0 = arith.constant 0 : i32
    %c0_i32_1 = arith.constant 0 : i32
    return %c0_i32, %c0_i32_0 : i32, i32
  }
  func.func @transform_4(%arg0: i32, %arg1: i32) -> (i32, i32) {
    %c0_i32 = arith.constant 0 : i32
    %c0_i32_0 = arith.constant 0 : i32
    %c0_i32_1 = arith.constant 0 : i32
    return %c0_i32, %c0_i32_0 : i32, i32
  }
  func.func @transform_5(%arg0: i32, %arg1: i32) -> (i32, i32) {
    %c0_i32 = arith.constant 0 : i32
    %c0_i32_0 = arith.constant 0 : i32
    %c0_i32_1 = arith.constant 0 : i32
    return %c0_i32, %c0_i32_0 : i32, i32
  }
  func.func @transform_6(%arg0: i32, %arg1: i32) -> (i32, i32) {
    %c0_i32 = arith.constant 0 : i32
    %c0_i32_0 = arith.constant 0 : i32
    %c0_i32_1 = arith.constant 0 : i32
    return %c0_i32, %c0_i32_0 : i32, i32
  }
  func.func @transform_7(%arg0: i32, %arg1: i32) -> (i32, i32) {
    %c0_i32 = arith.constant 0 : i32
    %c0_i32_0 = arith.constant 0 : i32
    return %arg0, %c0_i32 : i32, i32
  }
}

</mosaic_0001>

<bundles_post_ra>
// kernel: gcn_n_layer_forward.2
= control target key start
LH: loop header
LB: loop body
LE: loop exit
PB: predicated region body
PF: predicated region fallthrough
CT: control target
= control target key end

     0   :  { %s1284_s9 = smov 0   ;;  %s1503_s0 = inlined_call_operand.vmem [shape: bf16[256,384], index: 0, kind: input, shape index: {}]   ;;  %s1504_s1 = inlined_call_operand.vmem [shape: bf16[384,256], index: 1, kind: input, shape index: {}]   ;;  %s1505_s2 = inlined_call_operand.vmem [shape: bf16[256,256], index: 2, kind: output, shape index: {}]  }
   0x1 LB: > { %s997_s10 = sadd.s32 4294967295, %s1266_s9   ;;  %p1001_p0 = scmp.ge.s32.totalorder %s1266_s9, 1  ;;  %s1266_s9 = sphi %s1284_s9, %s12_s9  }
   0x2   : > { %p114_p1 = scmp.lt.s32.totalorder %s1266_s9, 3 }
   0x4   : > { %p115_p2 = pnand %p1001_p0, %p114_p1 }
   0x5   : > { %v1156_v0 = vld [vmem:[%s1504_s1 + $0x4] ss:$8 sps:$4 sm:$0xff] (!%p115_p2)   ;;  %v1158_v1 = vld [vmem:[%s1504_s1] ss:$8 sps:$4 sm:$0xff] (!%p115_p2)   ;;  %v1268_v2 = vmov (!%p115_p2), 0   ;;  %s1002_s17 = sshll.u32 (!%p115_p2), %s997_s10, 4 }
   0x6   : > { %118 = sbr.rel (%p115_p2) target bundleno = 346 (0x15a), region = 28  ;;  %746 = vmatprep.mubr.bf16.mxu0 (!%p115_p2), %v1268_v2  ;;  %601 = vmatprep.subr.bf16.mxu1 (!%p115_p2), %v1156_v0  ;;  %v1159_v3 = vld [vmem:[%s1504_s1 + $0x14] ss:$8 sps:$4 sm:$0xff] (!%p115_p2)   ;;  %v1161_v4 = vld [vmem:[%s1504_s1 + $0x10] ss:$8 sps:$4 sm:$0xff] (!%p115_p2)   ;;  %p139_p3 = scmp.lt.s32.totalorder (!%p115_p2), %s1002_s17, 31 }
   0x7   : > { %602 = vmatpush1.bf16.msra.mxu1 (!%p115_p2), %v1158_v1  ;;  %v1162_v5 = vld [vmem:[%s1504_s1 + $0x24] ss:$8 sps:$4 sm:$0xff] (!%p115_p2)   ;;  %v1164_v6 = vld [vmem:[%s1504_s1 + $0x20] ss:$8 sps:$4 sm:$0xff] (!%p115_p2)   ;;  %v1165_v7 = vld [vmem:[%s1504_s1 + $0x34] ss:$8 sps:$4 sm:$0xff] (!%p115_p2)  }
   0x8   : > { %603 = vmatprep.subr.bf16.mxu1 (!%p115_p2), %v1159_v3  ;;  %v1167_v8 = vld [vmem:[%s1504_s1 + $0x30] ss:$8 sps:$4 sm:$0xff] (!%p115_p2)   ;;  %v1180_v9 = vld [vmem:[%s1504_s1 + $0x104] ss:$8 sps:$4 sm:$0xff] (!%p115_p2)   ;;  %v1182_v10 = vld [vmem:[%s1504_s1 + $0x100] ss:$8 sps:$4 sm:$0xff] (!%p115_p2)  }
   0x9   : > { %v1168_v11 = vld [vmem:[%s1504_s1 + $0x44] ss:$8 sps:$4 sm:$0xff] (!%p115_p2)   ;;  %714 = vmatprep.subr.bf16.mxu0 (!%p115_p2), %v1180_v9  ;;  %v1186_v12 = vld [vmem:[%s1504_s1 + $0x114] ss:$8 sps:$4 sm:$0xff] (!%p115_p2)   ;;  %v1188_v13 = vld [vmem:[%s1504_s1 + $0x110] ss:$8 sps:$4 sm:$0xff] (!%p115_p2)  }
   0xa   : > { %715 = vmatpush1.bf16.msra.mxu0 (!%p115_p2), %v1182_v10  ;;  %v1170_v14 = vld [vmem:[%s1504_s1 + $0x40] ss:$8 sps:$4 sm:$0xff] (!%p115_p2)   ;;  %v1171_v15 = vld [vmem:[%s1504_s1 + $0x54] ss:$8 sps:$4 sm:$0xff] (!%p115_p2)   ;;  %v1192_v16 = vld [vmem:[%s1504_s1 + $0x124] ss:$8 sps:$4 sm:$0xff] (!%p115_p2)  }
   0xb   : > { %604 = vmatpush1.bf16.msra.mxu1 (!%p115_p2), %v1161_v4  ;;  %716 = vmatprep.subr.bf16.mxu0 (!%p115_p2), %v1186_v12  ;;  %v1194_v17 = vld [vmem:[%s1504_s1 + $0x120] ss:$8 sps:$4 sm:$0xff] (!%p115_p2)   ;;  %v1173_v18 = vld [vmem:[%s1504_s1 + $0x50] ss:$8 sps:$4 sm:$0xff] (!%p115_p2)   ;;  %v1198_v19 = vld [vmem:[%s1504_s1 + $0x134] ss:$8 sps:$4 sm:$0xff] (!%p115_p2)  }
   0xc   : > { %605 = vmatprep.subr.bf16.mxu1 (!%p115_p2), %v1162_v5  ;;  %v1174_v20 = vld [vmem:[%s1504_s1 + $0x64] ss:$8 sps:$4 sm:$0xff] (!%p115_p2)   ;;  %v1200_v21 = vld [vmem:[%s1504_s1 + $0x130] ss:$8 sps:$4 sm:$0xff] (!%p115_p2)   ;;  %v1176_v22 = vld [vmem:[%s1504_s1 + $0x60] ss:$8 sps:$4 sm:$0xff] (!%p115_p2)  }
   0xd   : > { %v1204_v23 = vld [vmem:[%s1504_s1 + $0x144] ss:$8 sps:$4 sm:$0xff]   ;;  %s1507_s17 = smov (!%p139_p3, %s1002_s17), 31  ;;  %v1177_v24 = vld [vmem:[%s1504_s1 + $0x74] ss:$8 sps:$4 sm:$0xff]  }
   0xe   : > { %717 = vmatpush1.bf16.msra.mxu0 %v1188_v13  ;;  %v1206_v25 = vld [vmem:[%s1504_s1 + $0x140] ss:$8 sps:$4 sm:$0xff]   ;;  %v1179_v26 = vld [vmem:[%s1504_s1 + $0x70] ss:$8 sps:$4 sm:$0xff]   ;;  %v1210_v27 = vld [vmem:[%s1504_s1 + $0x154] ss:$8 sps:$4 sm:$0xff]  }
   0xf   : > { %606 = vmatpush1.bf16.msra.mxu1 %v1164_v6  ;;  %718 = vmatprep.subr.bf16.mxu0 %v1192_v16  ;;  %s1146_s13 = smul.u32 12, %s1507_s17  ;;  %v1183_v28 = vld [vmem:[%s1504_s1 + $0x84] ss:$8 sps:$4 sm:$0xff]   ;;  %v1212_v29 = vld [vmem:[%s1504_s1 + $0x150] ss:$8 sps:$4 sm:$0xff]   ;;  %s1097_s6 = sshll.u32 %s1507_s17, 3 }
  0x10   : > { %607 = vmatprep.subr.bf16.mxu1 %v1165_v7  ;;  %v1185_v30 = vld [vmem:[%s1504_s1 + $0x80] ss:$8 sps:$4 sm:$0xff]   ;;  %v1216_v31 = vld [vmem:[%s1504_s1 + $0x164] ss:$8 sps:$4 sm:$0xff]   ;;  %v1189_v32 = vld [vmem:[%s1504_s1 + $0x94] ss:$8 sps:$4 sm:$0xff]   ;;  %s1482_s8 = scalar_lea.vmem %s1505_s2, %s1097_s6 }
  0x11   : > { %s1394_s25 = scalar_lea.vmem %s1503_s0, %s1146_s13  ;;  %v1191_v33 = vld [vmem:[%s1504_s1 + $0x90] ss:$8 sps:$4 sm:$0xff]   ;;  %v1218_v34 = vld [vmem:[%s1504_s1 + $0x160] ss:$8 sps:$4 sm:$0xff]   ;;  %v1222_v36 = vld [vmem:[%s1504_s1 + $0x174] ss:$8 sps:$4 sm:$0xff]  }
  0x12   : > { %719 = vmatpush1.bf16.msra.mxu0 %v1194_v17  ;;  %v1231_v35 = vld [vmem:[%s1394_s25 + $0x4] ss:$12 sps:$4 sm:$0xff]   ;;  %v1197_v39 = vld [vmem:[%s1504_s1 + $0xa0] ss:$8 sps:$4 sm:$0xff]   ;;  %v1201_v40 = vld [vmem:[%s1504_s1 + $0xb4] ss:$8 sps:$4 sm:$0xff]  }
  0x13   : > { %608 = vmatpush1.bf16.msra.mxu1 %v1167_v8  ;;  %720 = vmatprep.subr.bf16.mxu0 %v1198_v19  ;;  %v1195_v37 = vld [vmem:[%s1504_s1 + $0xa4] ss:$8 sps:$4 sm:$0xff]   ;;  %v1224_v38 = vld [vmem:[%s1504_s1 + $0x170] ss:$8 sps:$4 sm:$0xff]   ;;  %v1228_v41 = vld [vmem:[%s1394_s25 + $0x8] ss:$12 sps:$4 sm:$0xff]  }
  0x14   : > { %609 = vmatprep.subr.bf16.mxu1 %v1168_v11  ;;  %633 = vmatprep.mubr.bf16.mxu1 %v1231_v35  ;;  %v1203_v42 = vld [vmem:[%s1504_s1 + $0xb0] ss:$8 sps:$4 sm:$0xff]   ;;  %v1207_v43 = vld [vmem:[%s1504_s1 + $0xc4] ss:$8 sps:$4 sm:$0xff]   ;;  %v1209_v44 = vld [vmem:[%s1504_s1 + $0xc0] ss:$8 sps:$4 sm:$0xff]  }
  0x15   : > { %v1213_v45 = vld [vmem:[%s1504_s1 + $0xd4] ss:$8 sps:$4 sm:$0xff]   ;;  %v1232_v46 = vld [vmem:[%s1394_s25 + $0x20] ss:$12 sps:$4 sm:$0xff]   ;;  %v1215_v47 = vld [vmem:[%s1504_s1 + $0xd0] ss:$8 sps:$4 sm:$0xff]  }
  0x16   : > { %721 = vmatpush1.bf16.msra.mxu0 %v1200_v21  ;;  %v1219_v48 = vld [vmem:[%s1504_s1 + $0xe4] ss:$8 sps:$4 sm:$0xff]   ;;  %v1221_v49 = vld [vmem:[%s1504_s1 + $0xe0] ss:$8 sps:$4 sm:$0xff]   ;;  %v1225_v50 = vld [vmem:[%s1504_s1 + $0xf4] ss:$8 sps:$4 sm:$0xff]  }
  0x17   : > { %610 = vmatpush1.bf16.msra.mxu1 %v1170_v14  ;;  %722 = vmatprep.subr.bf16.mxu0 %v1204_v23  ;;  %v1236_v51 = vld [vmem:[%s1394_s25 + $0x38] ss:$12 sps:$4 sm:$0xff]   ;;  %v1229_v53 = vld [vmem:[%s1394_s25] ss:$12 sps:$4 sm:$0xff]   ;;  %v1233_v54 = vld [vmem:[%s1394_s25 + $0x1c] ss:$12 sps:$4 sm:$0xff]  }
  0x18   : > { %611 = vmatprep.subr.bf16.mxu1 %v1171_v15  ;;  %v1227_v52 = vld [vmem:[%s1504_s1 + $0xf0] ss:$8 sps:$4 sm:$0xff]   ;;  %v1237_v57 = vld [vmem:[%s1394_s25 + $0x34] ss:$12 sps:$4 sm:$0xff]   ;;  %v1249_v3 = vld [vmem:[%s1394_s25 + $0x7c] ss:$12 sps:$4 sm:$0xff]  }
  0x19   : > { %v1240_v55 = vld [vmem:[%s1394_s25 + $0x50] ss:$12 sps:$4 sm:$0xff]   ;;  %v1235_v56 = vld [vmem:[%s1394_s25 + $0x18] ss:$12 sps:$4 sm:$0xff]   ;;  %v1244_v58 = vld [vmem:[%s1394_s25 + $0x68] ss:$12 sps:$4 sm:$0xff]  }
  0x1a   : > { %723 = vmatpush1.bf16.msra.mxu0 %v1206_v25  ;;  %v1239_v59 = vld [vmem:[%s1394_s25 + $0x30] ss:$12 sps:$4 sm:$0xff]   ;;  %v1241_v60 = vld [vmem:[%s1394_s25 + $0x4c] ss:$12 sps:$4 sm:$0xff]   ;;  %v1243_v62 = vld [vmem:[%s1394_s25 + $0x48] ss:$12 sps:$4 sm:$0xff]  }
  0x1b   : > { %612 = vmatpush1.bf16.msra.mxu1 %v1173_v18  ;;  %724 = vmatprep.subr.bf16.mxu0 %v1210_v27  ;;  %v1248_v61 = vld [vmem:[%s1394_s25 + $0x80] ss:$12 sps:$4 sm:$0xff]   ;;  %v1245_v63 = vld [vmem:[%s1394_s25 + $0x64] ss:$12 sps:$4 sm:$0xff]   ;;  %v1259_v9 = vld [vmem:[%s1394_s25 + $0xa8] ss:$12 sps:$4 sm:$0xff]  }
  0x1c   : > { %613 = vmatprep.subr.bf16.mxu1 %v1174_v20  ;;  %v1252_v0 = vld [vmem:[%s1394_s25 + $0x98] ss:$12 sps:$4 sm:$0xff]   ;;  %v1247_v1 = vld [vmem:[%s1394_s25 + $0x60] ss:$12 sps:$4 sm:$0xff]   ;;  %v1256_v4 = vld [vmem:[%s1394_s25 + $0xb0] ss:$12 sps:$4 sm:$0xff]  }
  0x1d   : > { %v1251_v5 = vld [vmem:[%s1394_s25 + $0x78] ss:$12 sps:$4 sm:$0xff]   ;;  %v1253_v6 = vld [vmem:[%s1394_s25 + $0x94] ss:$12 sps:$4 sm:$0xff]   ;;  %v1255_v7 = vld [vmem:[%s1394_s25 + $0x90] ss:$12 sps:$4 sm:$0xff]  }
  0x1e   : > { %725 = vmatpush1.bf16.msra.mxu0 %v1212_v29  ;;  %v1257_v8 = vld [vmem:[%s1394_s25 + $0xac] ss:$12 sps:$4 sm:$0xff]  }
  0x1f   : > { %614 = vmatpush1.bf16.msra.mxu1 %v1176_v22  ;;  %726 = vmatprep.subr.bf16.mxu0 %v1216_v31 }
  0x20   : > { %615 = vmatprep.subr.bf16.mxu1 %v1177_v24 }
  0x22   : > { %727 = vmatpush1.bf16.msra.mxu0 %v1218_v34 }
  0x23   : > { %616 = vmatpush1.bf16.msra.mxu1 %v1179_v26  ;;  %728 = vmatprep.subr.bf16.mxu0 %v1222_v36 }
  0x24   : > { %617 = vmatprep.subr.bf16.mxu1 %v1183_v28 }
  0x26   : > { %729 = vmatpush1.bf16.msra.mxu0 %v1224_v38 }
  0x27   : > { %618 = vmatpush1.bf16.msra.mxu1 %v1185_v30 }
  0x28   : > { %619 = vmatprep.subr.bf16.mxu1 %v1189_v32 }
  0x29   : > { %747 = vmatmul.mubr.bf16.vlgmr.msra.gmra.mrb[0].mxu0 %v1228_v41 }
  0x2a   : > { %756 = vmatprep.mubr.bf16.mxu0 %v1268_v2 }
  0x2b   : > { %620 = vmatpush1.bf16.msra.mxu1 %v1191_v33 }
  0x2c   : > { %621 = vmatprep.subr.bf16.mxu1 %v1195_v37 }
  0x2f   : > { %622 = vmatpush1.bf16.msra.mxu1 %v1197_v39 }
  0x30   : > { %623 = vmatprep.subr.bf16.mxu1 %v1201_v40 }
  0x31   : > { %757 = vmatmul.mubr.bf16.gmra.mrb[4].mxu0 %v1232_v46 }
  0x32   : > { %766 = vmatprep.mubr.bf16.mxu0 %v1268_v2 }
  0x33   : > { %624 = vmatpush1.bf16.msra.mxu1 %v1203_v42 }
  0x34   : > { %625 = vmatprep.subr.bf16.mxu1 %v1207_v43 }
  0x37   : > { %626 = vmatpush1.bf16.msra.mxu1 %v1209_v44 }
  0x38   : > { %627 = vmatprep.subr.bf16.mxu1 %v1213_v45 }
  0x39   : > { %767 = vmatmul.mubr.bf16.gmra.mrb[8].mxu0 %v1236_v51 }
  0x3a   : > { %776 = vmatprep.mubr.bf16.mxu0 %v1268_v2 }
  0x3b   : > { %628 = vmatpush1.bf16.msra.mxu1 %v1215_v47 }
  0x3c   : > { %629 = vmatprep.subr.bf16.mxu1 %v1219_v48 }
  0x3f   : > { %630 = vmatpush1.bf16.msra.mxu1 %v1221_v49 }
  0x40   : > { %631 = vmatprep.subr.bf16.mxu1 %v1225_v50 }
  0x41   : > { %777 = vmatmul.mubr.bf16.gmra.mrb[12].mxu0 %v1240_v55 }
  0x42   : > { %786 = vmatprep.mubr.bf16.mxu0 %v1268_v2 }
  0x43   : > { %632 = vmatpush1.bf16.msra.mxu1 %v1227_v52 }
  0x46   : > { %634 = vmatmul.mubr.bf16.vlgmr.msra.gmra.mrb[0].mxu1 %v1229_v53 }
  0x47   : > { %643 = vmatprep.mubr.bf16.mxu1 %v1233_v54 }
  0x49   : > { %787 = vmatmul.mubr.bf16.gmra.mrb[16].mxu0 %v1244_v58 }
  0x4a   : > { %796 = vmatprep.mubr.bf16.mxu0 %v1268_v2 }
  0x4e   : > { %644 = vmatmul.mubr.bf16.gmra.mrb[4].mxu1 %v1235_v56 }
  0x4f   : > { %653 = vmatprep.mubr.bf16.mxu1 %v1237_v57 }
  0x51   : > { %797 = vmatmul.mubr.bf16.gmra.mrb[20].mxu0 %v1248_v61 }
  0x52   : > { %806 = vmatprep.mubr.bf16.mxu0 %v1268_v2 }
  0x56   : > { %654 = vmatmul.mubr.bf16.gmra.mrb[8].mxu1 %v1239_v59 }
  0x57   : > { %663 = vmatprep.mubr.bf16.mxu1 %v1241_v60 }
  0x59   : > { %807 = vmatmul.mubr.bf16.gmra.mrb[24].mxu0 %v1252_v0 }
  0x5a   : > { %816 = vmatprep.mubr.bf16.mxu0 %v1268_v2 }
  0x5e   : > { %664 = vmatmul.mubr.bf16.gmra.mrb[12].mxu1 %v1243_v62 }
  0x5f   : > { %673 = vmatprep.mubr.bf16.mxu1 %v1245_v63 }
  0x61   : > { %817 = vmatmul.mubr.bf16.gmra.mrb[28].mxu0 %v1256_v4 }
  0x66   : > { %674 = vmatmul.mubr.bf16.gmra.mrb[16].mxu1 %v1247_v1 }
  0x67   : > { %683 = vmatprep.mubr.bf16.mxu1 %v1249_v3 }
  0x6e   : > { %684 = vmatmul.mubr.bf16.gmra.mrb[20].mxu1 %v1251_v5 }
  0x6f   : > { %693 = vmatprep.mubr.bf16.mxu1 %v1253_v6 }
  0x76   : > { %694 = vmatmul.mubr.bf16.gmra.mrb[24].mxu1 %v1255_v7 }
  0x77   : > { %703 = vmatprep.mubr.bf16.mxu1 %v1257_v8 }
  0x7e   : > { %704 = vmatmul.mubr.bf16.gmra.mrb[28].mxu1 %v1259_v9 }
  0xfc   : > { %v748_v10 = vpop.f32.mrb[0].mxu0 }
  0xfd   : > { %v750_v11 = vpop.f32.mrb[1].mxu0 }
  0xfe   : > { %v752_v12 = vpop.f32.mrb[2].mxu0 }
  0xff   : > { %v754_v2 = vpop.f32.mrb[3].mxu0 }
 0x104   : > { %v758_v13 = vpop.f32.mrb[4].mxu0 }
 0x105   : > { %v760_v14 = vpop.f32.mrb[5].mxu0 }
 0x106   : > { %v762_v15 = vpop.f32.mrb[6].mxu0 }
 0x107   : > { %v764_v16 = vpop.f32.mrb[7].mxu0 }
 0x10c   : > { %v768_v17 = vpop.f32.mrb[8].mxu0 }
 0x10d   : > { %v770_v18 = vpop.f32.mrb[9].mxu0 }
 0x10e   : > { %v772_v19 = vpop.f32.mrb[10].mxu0 }
 0x10f   : > { %v774_v20 = vpop.f32.mrb[11].mxu0 }
 0x114   : > { %v778_v28 = vpop.f32.mrb[12].mxu0 }
 0x115   : > { %v780_v31 = vpop.f32.mrb[13].mxu0 }
 0x116   : > { %v782_v32 = vpop.f32.mrb[14].mxu0 }
 0x117   : > { %v784_v34 = vpop.f32.mrb[15].mxu0 }
 0x119   : > { %v635_v21 = vpop.f32.mrb[0].mxu1 }
 0x11a   : > { %v749_v22 = vadd.f32 %v748_v10, %v635_v21  ;;  %v637_v23 = vpop.f32.mrb[1].mxu1 }
 0x11b   : > { %v751_v24 = vadd.f32 %v750_v11, %v637_v23  ;;  %v639_v25 = vpop.f32.mrb[2].mxu1 }
 0x11c   : > { %v753_v26 = vadd.f32 %v752_v12, %v639_v25  ;;  %v641_v27 = vpop.f32.mrb[3].mxu1  ;;  %v788_v42 = vpop.f32.mrb[16].mxu0 }
 0x11d   : > { %v1098_v29 = vpack.c.bf16 %v751_v24, %v749_v22  ;;  %v755_v30 = vadd.f32 %v754_v2, %v641_v27  ;;  %v790_v45 = vpop.f32.mrb[17].mxu0 }
 0x11e   : > { %v792_v46 = vpop.f32.mrb[18].mxu0 }
 0x11f   : > { %923 = vst [vmem:[%s1482_s8] sm:$0xff] %v1098_v29  ;;  %v1099_v33 = vpack.c.bf16 %v755_v30, %v753_v26  ;;  %v794_v48 = vpop.f32.mrb[19].mxu0 }
 0x121   : > { %924 = vst [vmem:[%s1482_s8 + $0x8] sm:$0xff] %v1099_v33  ;;  %v645_v35 = vpop.f32.mrb[4].mxu1 }
 0x122   : > { %v759_v36 = vadd.f32 %v758_v13, %v645_v35  ;;  %v647_v37 = vpop.f32.mrb[5].mxu1 }
 0x123   : > { %v761_v38 = vadd.f32 %v760_v14, %v647_v37  ;;  %v649_v39 = vpop.f32.mrb[6].mxu1 }
 0x124   : > { %v763_v40 = vadd.f32 %v762_v15, %v649_v39  ;;  %v651_v41 = vpop.f32.mrb[7].mxu1  ;;  %v798_v56 = vpop.f32.mrb[20].mxu0 }
 0x125   : > { %v1100_v43 = vpack.c.bf16 %v761_v38, %v759_v36  ;;  %v765_v44 = vadd.f32 %v764_v16, %v651_v41  ;;  %v800_v59 = vpop.f32.mrb[21].mxu0 }
 0x126   : > { %v802_v60 = vpop.f32.mrb[22].mxu0 }
 0x127   : > { %925 = vst [vmem:[%s1482_s8 + $0x10] sm:$0xff] %v1100_v43  ;;  %v1101_v47 = vpack.c.bf16 %v765_v44, %v763_v40  ;;  %v804_v62 = vpop.f32.mrb[23].mxu0 }
 0x129   : > { %926 = vst [vmem:[%s1482_s8 + $0x18] sm:$0xff] %v1101_v47  ;;  %v655_v49 = vpop.f32.mrb[8].mxu1 }
 0x12a   : > { %v769_v50 = vadd.f32 %v768_v17, %v655_v49  ;;  %v657_v51 = vpop.f32.mrb[9].mxu1 }
 0x12b   : > { %v771_v52 = vadd.f32 %v770_v18, %v657_v51  ;;  %v659_v53 = vpop.f32.mrb[10].mxu1 }
 0x12c   : > { %v773_v54 = vadd.f32 %v772_v19, %v659_v53  ;;  %v661_v55 = vpop.f32.mrb[11].mxu1  ;;  %v808_v7 = vpop.f32.mrb[24].mxu0 }
 0x12d   : > { %v1102_v57 = vpack.c.bf16 %v771_v52, %v769_v50  ;;  %v775_v58 = vadd.f32 %v774_v20, %v661_v55  ;;  %v810_v10 = vpop.f32.mrb[25].mxu0 }
 0x12e   : > { %v812_v11 = vpop.f32.mrb[26].mxu0 }
 0x12f   : > { %927 = vst [vmem:[%s1482_s8 + $0x20] sm:$0xff] %v1102_v57  ;;  %v1103_v61 = vpack.c.bf16 %v775_v58, %v773_v54  ;;  %v814_v2 = vpop.f32.mrb[27].mxu0 }
 0x131   : > { %928 = vst [vmem:[%s1482_s8 + $0x28] sm:$0xff] %v1103_v61  ;;  %v665_v63 = vpop.f32.mrb[12].mxu1 }
 0x132   : > { %v779_v0 = vadd.f32 %v778_v28, %v665_v63  ;;  %v667_v1 = vpop.f32.mrb[13].mxu1 }
 0x133   : > { %v781_v3 = vadd.f32 %v780_v31, %v667_v1  ;;  %v669_v4 = vpop.f32.mrb[14].mxu1 }
 0x134   : > { %v783_v5 = vadd.f32 %v782_v32, %v669_v4  ;;  %v671_v6 = vpop.f32.mrb[15].mxu1  ;;  %v818_v20 = vpop.f32.mrb[28].mxu0 }
 0x135   : > { %v1104_v8 = vpack.c.bf16 %v781_v3, %v779_v0  ;;  %v785_v9 = vadd.f32 %v784_v34, %v671_v6  ;;  %v820_v23 = vpop.f32.mrb[29].mxu0 }
 0x136   : > { %v822_v24 = vpop.f32.mrb[30].mxu0 }
 0x137   : > { %929 = vst [vmem:[%s1482_s8 + $0x30] sm:$0xff] %v1104_v8  ;;  %v1105_v12 = vpack.c.bf16 %v785_v9, %v783_v5  ;;  %v824_v26 = vpop.f32.mrb[31].mxu0 }
 0x139   : > { %930 = vst [vmem:[%s1482_s8 + $0x38] sm:$0xff] %v1105_v12  ;;  %v675_v13 = vpop.f32.mrb[16].mxu1 }
 0x13a   : > { %v789_v14 = vadd.f32 %v788_v42, %v675_v13  ;;  %v677_v15 = vpop.f32.mrb[17].mxu1 }
 0x13b   : > { %v791_v16 = vadd.f32 %v790_v45, %v677_v15  ;;  %v679_v17 = vpop.f32.mrb[18].mxu1 }
 0x13c   : > { %v793_v18 = vadd.f32 %v792_v46, %v679_v17  ;;  %v681_v19 = vpop.f32.mrb[19].mxu1 }
 0x13d   : > { %v1106_v21 = vpack.c.bf16 %v791_v16, %v789_v14  ;;  %v795_v22 = vadd.f32 %v794_v48, %v681_v19 }
 0x13f   : > { %931 = vst [vmem:[%s1482_s8 + $0x40] sm:$0xff] %v1106_v21  ;;  %v1107_v25 = vpack.c.bf16 %v795_v22, %v793_v18 }
 0x141   : > { %932 = vst [vmem:[%s1482_s8 + $0x48] sm:$0xff] %v1107_v25  ;;  %v685_v27 = vpop.f32.mrb[20].mxu1 }
 0x142   : > { %v799_v28 = vadd.f32 %v798_v56, %v685_v27  ;;  %v687_v29 = vpop.f32.mrb[21].mxu1 }
 0x143   : > { %v801_v30 = vadd.f32 %v800_v59, %v687_v29  ;;  %v689_v31 = vpop.f32.mrb[22].mxu1 }
 0x144   : > { %v803_v32 = vadd.f32 %v802_v60, %v689_v31  ;;  %v691_v33 = vpop.f32.mrb[23].mxu1 }
 0x145   : > { %v1108_v34 = vpack.c.bf16 %v801_v30, %v799_v28  ;;  %v805_v35 = vadd.f32 %v804_v62, %v691_v33 }
 0x147   : > { %933 = vst [vmem:[%s1482_s8 + $0x50] sm:$0xff] %v1108_v34  ;;  %v1109_v36 = vpack.c.bf16 %v805_v35, %v803_v32 }
 0x149   : > { %934 = vst [vmem:[%s1482_s8 + $0x58] sm:$0xff] %v1109_v36  ;;  %v695_v37 = vpop.f32.mrb[24].mxu1 }
 0x14a   : > { %v809_v38 = vadd.f32 %v808_v7, %v695_v37  ;;  %v697_v39 = vpop.f32.mrb[25].mxu1 }
 0x14b   : > { %v811_v40 = vadd.f32 %v810_v10, %v697_v39  ;;  %v699_v41 = vpop.f32.mrb[26].mxu1 }
 0x14c   : > { %v813_v42 = vadd.f32 %v812_v11, %v699_v41  ;;  %v701_v43 = vpop.f32.mrb[27].mxu1 }
 0x14d   : > { %v1110_v44 = vpack.c.bf16 %v811_v40, %v809_v38  ;;  %v815_v45 = vadd.f32 %v814_v2, %v701_v43 }
 0x14f   : > { %935 = vst [vmem:[%s1482_s8 + $0x60] sm:$0xff] %v1110_v44  ;;  %v1111_v46 = vpack.c.bf16 %v815_v45, %v813_v42 }
 0x151   : > { %936 = vst [vmem:[%s1482_s8 + $0x68] sm:$0xff] %v1111_v46  ;;  %v705_v47 = vpop.f32.mrb[28].mxu1 }
 0x152   : > { %v819_v48 = vadd.f32 %v818_v20, %v705_v47  ;;  %v707_v49 = vpop.f32.mrb[29].mxu1 }
 0x153   : > { %v821_v50 = vadd.f32 %v820_v23, %v707_v49  ;;  %v709_v51 = vpop.f32.mrb[30].mxu1 }
 0x154   : > { %v823_v52 = vadd.f32 %v822_v24, %v709_v51  ;;  %v711_v53 = vpop.f32.mrb[31].mxu1 }
 0x155   : > { %v1112_v54 = vpack.c.bf16 %v821_v50, %v819_v48  ;;  %v825_v55 = vadd.f32 %v824_v26, %v711_v53 }
 0x157   : > { %937 = vst [vmem:[%s1482_s8 + $0x70] sm:$0xff] %v1112_v54  ;;  %v1113_v56 = vpack.c.bf16 %v825_v55, %v823_v52 }
 0x159   : > { %938 = vst [vmem:[%s1482_s8 + $0x78] sm:$0xff] %v1113_v56 }
 0x15a PF: > { %s12_s9 = sadd.s32 1, %s1266_s9  }
 0x15b   : > { %p9_p4 = scmp.ge.s32.totalorder %s12_s9, 4  }
 0x15d   :  { %11 = sbr.rel (!%p9_p4) target bundleno = 1 (0x1), region = 58 }

// kernel: gcn_n_layer_forward.3
= control target key start
LH: loop header
LB: loop body
LE: loop exit
PB: predicated region body
PF: predicated region fallthrough
CT: control target
= control target key end

     0   :  { %s2274_s24 = smov 0   ;;  %s2276_s25 = smov 0   ;;  %s2793_s0 = inlined_call_operand.vmem [shape: bf16[256,256], index: 0, kind: input, shape index: {}]   ;;  %s2794_s1 = inlined_call_operand.vmem [shape: bf16[256,256], index: 1, kind: input, shape index: {}]   ;;  %s2795_s2 = inlined_call_operand.vmem [shape: f32[1,256], index: 2, kind: input, shape index: {}]   ;;  %s2796_s3 = inlined_call_operand.vmem [shape: bf16[256,256], index: 3, kind: input, shape index: {}]   ;;  %s2797_s4 = inlined_call_operand.vmem [shape: f32[1,256], index: 4, kind: input, shape index: {}]   ;;  %s2798_s5 = inlined_call_operand.vmem [shape: bf16[256,128], index: 5, kind: input, shape index: {}]   ;;  %s2799_s6 = inlined_call_operand.vmem [shape: f32[1,128], index: 6, kind: input, shape index: {}]   ;;  %s2800_s7 = inlined_call_operand.vmem [shape: f32[256,128], index: 7, kind: output, shape index: {}]  }
   0x1   :  { %s2278_s26 = smov 0  }
   0x2 LB: > { %s29_s27 = sadd.s32 1, %s2228_s25  ;;  %p1880_p0 = scmp.ge.s32.totalorder %s2232_s26, 1  ;;  %s2232_s26 = sphi %s2278_s26, %s17_s26   ;;  %s2228_s25 = sphi %s2276_s25, %s2802_s25   ;;  %s2224_s24 = sphi %s2274_s24, %s2801_s24  }
   0x3   : > { %p31_p1 = scmp.ge.s32.totalorder %s29_s27, 2  ;;  %p270_p2 = scmp.lt.s32.totalorder %s2232_s26, 3 }
   0x5   : > { %s2804_s27 = smov (%p31_p1, %s29_s27), 0  ;;  %p271_p3 = pnand %p1880_p0, %p270_p2 }
   0x6   : > { %v2074_v0 = vld [vmem:[%s2794_s1 + $0x4] ss:$8 sps:$4 sm:$0xff] (!%p271_p3)   ;;  %v2076_v1 = vld [vmem:[%s2794_s1] ss:$8 sps:$4 sm:$0xff] (!%p271_p3)   ;;  %v2077_v2 = vld [vmem:[%s2794_s1 + $0x14] ss:$8 sps:$4 sm:$0xff] (!%p271_p3)  }
   0x7   : > { %274 = sbr.rel (%p271_p3) target bundleno = 1015 (0x3f7), region = 48  ;;  %695 = vmatprep.subr.bf16.mxu0 (!%p271_p3), %v2074_v0  ;;  %v2079_v3 = vld [vmem:[%s2794_s1 + $0x10] ss:$8 sps:$4 sm:$0xff] (!%p271_p3)   ;;  %v2080_v4 = vld [vmem:[%s2794_s1 + $0x24] ss:$8 sps:$4 sm:$0xff] (!%p271_p3)   ;;  %s1881_s15 = sshll.u32 (!%p271_p3), %s2224_s24, 4 }
   0x8   : > { %696 = vmatpush1.bf16.msra.mxu0 (!%p271_p3), %v2076_v1  ;;  %v2082_v5 = vld [vmem:[%s2794_s1 + $0x20] ss:$8 sps:$4 sm:$0xff] (!%p271_p3)   ;;  %v2083_v6 = vld [vmem:[%s2794_s1 + $0x34] ss:$8 sps:$4 sm:$0xff] (!%p271_p3)   ;;  %p315_p4 = scmp.lt.s32.totalorder (!%p271_p3), %s1881_s15, 31 }
   0x9   : > { %697 = vmatprep.subr.bf16.mxu0 (!%p271_p3), %v2077_v2  ;;  %v2085_v7 = vld [vmem:[%s2794_s1 + $0x30] ss:$8 sps:$4 sm:$0xff] (!%p271_p3)   ;;  %v2086_v8 = vld [vmem:[%s2794_s1 + $0x44] ss:$8 sps:$4 sm:$0xff] (!%p271_p3)   ;;  %v2088_v9 = vld [vmem:[%s2794_s1 + $0x40] ss:$8 sps:$4 sm:$0xff] (!%p271_p3)  }
   0xa   : > { %v2089_v10 = vld [vmem:[%s2794_s1 + $0x54] ss:$8 sps:$4 sm:$0xff] (!%p271_p3)   ;;  %v2091_v11 = vld [vmem:[%s2794_s1 + $0x50] ss:$8 sps:$4 sm:$0xff] (!%p271_p3)   ;;  %v2092_v12 = vld [vmem:[%s2794_s1 + $0x64] ss:$8 sps:$4 sm:$0xff] (!%p271_p3)  }
   0xb   : > { %v2094_v14 = vld [vmem:[%s2794_s1 + $0x60] ss:$8 sps:$4 sm:$0xff] (!%p271_p3)   ;;  %v2095_v15 = vld [vmem:[%s2794_s1 + $0x74] ss:$8 sps:$4 sm:$0xff] (!%p271_p3)   ;;  %v2097_v16 = vld [vmem:[%s2794_s1 + $0x70] ss:$8 sps:$4 sm:$0xff] (!%p271_p3)  }
   0xc   : > { %698 = vmatpush1.bf16.msra.mxu0 (!%p271_p3), %v2079_v3  ;;  %v2098_v17 = vld [vmem:[%s2794_s1 + $0x84] ss:$8 sps:$4 sm:$0xff] (!%p271_p3)   ;;  %v2100_v18 = vld [vmem:[%s2794_s1 + $0x80] ss:$8 sps:$4 sm:$0xff] (!%p271_p3)   ;;  %v2101_v19 = vld [vmem:[%s2794_s1 + $0x94] ss:$8 sps:$4 sm:$0xff] (!%p271_p3)  }
   0xd   : > { %699 = vmatprep.subr.bf16.mxu0 (!%p271_p3), %v2080_v4  ;;  %v2363_v20 = vld [vmem:[%s2796_s3 + $0x4] ss:$8 sps:$4 sm:$0xff] (!%p271_p3)   ;;  %v2368_v21 = vld [vmem:[%s2796_s3] ss:$8 sps:$4 sm:$0xff] (!%p271_p3)   ;;  %v2103_v22 = vld [vmem:[%s2794_s1 + $0x90] ss:$8 sps:$4 sm:$0xff] (!%p271_p3)  }
   0xe   : > { %s2806_s15 = smov (!%p315_p4, %s1881_s15), 31  ;;  %1204 = vmatprep.subr.bf16.mxu1 %v2363_v20  ;;  %v2377_v23 = vld [vmem:[%s2796_s3 + $0x14] ss:$8 sps:$4 sm:$0xff]   ;;  %v2104_v24 = vld [vmem:[%s2794_s1 + $0xa4] ss:$8 sps:$4 sm:$0xff]  }
   0xf   : > { %s1985_s8 = sshll.u32 %s2806_s15, 3  ;;  %1205 = vmatpush1.bf16.msra.mxu1 %v2368_v21  ;;  %v2386_v25 = vld [vmem:[%s2796_s3 + $0x10] ss:$8 sps:$4 sm:$0xff]   ;;  %v2392_v26 = vld [vmem:[%s2796_s3 + $0x24] ss:$8 sps:$4 sm:$0xff]  }
  0x10   : > { %700 = vmatpush1.bf16.msra.mxu0 %v2082_v5  ;;  %s2336_s13 = scalar_lea.vmem %s2793_s0, %s1985_s8  ;;  %1206 = vmatprep.subr.bf16.mxu1 %v2377_v23  ;;  %v2106_v27 = vld [vmem:[%s2794_s1 + $0xa0] ss:$8 sps:$4 sm:$0xff]   ;;  %v2107_v28 = vld [vmem:[%s2794_s1 + $0xb4] ss:$8 sps:$4 sm:$0xff]   ;;  %v2109_v31 = vld [vmem:[%s2794_s1 + $0xb0] ss:$8 sps:$4 sm:$0xff]   ;;  %s2751_s20 = scalar_lea.vmem %s2800_s7, %s1985_s8 }
  0x11   : > { %701 = vmatprep.subr.bf16.mxu0 %v2083_v6  ;;  %v2124_v13 = vld [vmem:[%s2336_s13 + $0x4] ss:$8 sps:$4 sm:$0xff]   ;;  %v2404_v29 = vld [vmem:[%s2796_s3 + $0x20] ss:$8 sps:$4 sm:$0xff]   ;;  %v2410_v30 = vld [vmem:[%s2796_s3 + $0x34] ss:$8 sps:$4 sm:$0xff]  }
  0x12   : > { %727 = vmatprep.mubr.bf16.mxu0 %v2124_v13  ;;  %v2110_v32 = vld [vmem:[%s2794_s1 + $0xc4] ss:$8 sps:$4 sm:$0xff]   ;;  %v2422_v33 = vld [vmem:[%s2796_s3 + $0x30] ss:$8 sps:$4 sm:$0xff]   ;;  %v2112_v35 = vld [vmem:[%s2794_s1 + $0xc0] ss:$8 sps:$4 sm:$0xff]  }
  0x13   : > { %1207 = vmatpush1.bf16.msra.mxu1 %v2386_v25  ;;  %v2428_v34 = vld [vmem:[%s2796_s3 + $0x44] ss:$8 sps:$4 sm:$0xff]   ;;  %v2113_v36 = vld [vmem:[%s2794_s1 + $0xd4] ss:$8 sps:$4 sm:$0xff]   ;;  %v2440_v37 = vld [vmem:[%s2796_s3 + $0x40] ss:$8 sps:$4 sm:$0xff]  }
  0x14   : > { %702 = vmatpush1.bf16.msra.mxu0 %v2085_v7  ;;  %1208 = vmatprep.subr.bf16.mxu1 %v2392_v26  ;;  %v2446_v38 = vld [vmem:[%s2796_s3 + $0x54] ss:$8 sps:$4 sm:$0xff]   ;;  %v2115_v39 = vld [vmem:[%s2794_s1 + $0xd0] ss:$8 sps:$4 sm:$0xff]   ;;  %v2116_v41 = vld [vmem:[%s2794_s1 + $0xe4] ss:$8 sps:$4 sm:$0xff]  }
  0x15   : > { %703 = vmatprep.subr.bf16.mxu0 %v2086_v8  ;;  %v2454_v40 = vld [vmem:[%s2796_s3 + $0x50] ss:$8 sps:$4 sm:$0xff]   ;;  %v2462_v42 = vld [vmem:[%s2796_s3 + $0x64] ss:$8 sps:$4 sm:$0xff]   ;;  %v2118_v43 = vld [vmem:[%s2794_s1 + $0xe0] ss:$8 sps:$4 sm:$0xff]  }
  0x16   : > { %v2472_v44 = vld [vmem:[%s2796_s3 + $0x60] ss:$8 sps:$4 sm:$0xff]   ;;  %v2119_v45 = vld [vmem:[%s2794_s1 + $0xf4] ss:$8 sps:$4 sm:$0xff]   ;;  %v2121_v47 = vld [vmem:[%s2794_s1 + $0xf0] ss:$8 sps:$4 sm:$0xff]  }
  0x17   : > { %1209 = vmatpush1.bf16.msra.mxu1 %v2404_v29  ;;  %v2480_v46 = vld [vmem:[%s2796_s3 + $0x74] ss:$8 sps:$4 sm:$0xff]   ;;  %v2169_v48 = vld [vmem:[%s2796_s3 + $0x70] ss:$8 sps:$4 sm:$0xff]   ;;  %v2170_v49 = vld [vmem:[%s2796_s3 + $0x84] ss:$8 sps:$4 sm:$0xff]  }
  0x18   : > { %704 = vmatpush1.bf16.msra.mxu0 %v2088_v9  ;;  %1210 = vmatprep.subr.bf16.mxu1 %v2410_v30  ;;  %v2122_v50 = vld [vmem:[%s2336_s13] ss:$8 sps:$4 sm:$0xff]   ;;  %v2125_v51 = vld [vmem:[%s2336_s13 + $0x14] ss:$8 sps:$4 sm:$0xff]   ;;  %v2175_v54 = vld [vmem:[%s2796_s3 + $0x90] ss:$8 sps:$4 sm:$0xff]  }
  0x19   : > { %705 = vmatprep.subr.bf16.mxu0 %v2089_v10  ;;  %v2172_v52 = vld [vmem:[%s2796_s3 + $0x80] ss:$8 sps:$4 sm:$0xff]   ;;  %v2173_v53 = vld [vmem:[%s2796_s3 + $0x94] ss:$8 sps:$4 sm:$0xff]   ;;  %v2176_v55 = vld [vmem:[%s2796_s3 + $0xa4] ss:$8 sps:$4 sm:$0xff]  }
  0x1a   : > { %v2127_v56 = vld [vmem:[%s2336_s13 + $0x10] ss:$8 sps:$4 sm:$0xff]   ;;  %v2128_v57 = vld [vmem:[%s2336_s13 + $0x24] ss:$8 sps:$4 sm:$0xff]   ;;  %v2178_v58 = vld [vmem:[%s2796_s3 + $0xa0] ss:$8 sps:$4 sm:$0xff]  }
  0x1b   : > { %1211 = vmatpush1.bf16.msra.mxu1 %v2422_v33  ;;  %v2179_v59 = vld [vmem:[%s2796_s3 + $0xb4] ss:$8 sps:$4 sm:$0xff]   ;;  %v2181_v60 = vld [vmem:[%s2796_s3 + $0xb0] ss:$8 sps:$4 sm:$0xff]   ;;  %v2182_v61 = vld [vmem:[%s2796_s3 + $0xc4] ss:$8 sps:$4 sm:$0xff]  }
  0x1c   : > { %706 = vmatpush1.bf16.msra.mxu0 %v2091_v11  ;;  %1212 = vmatprep.subr.bf16.mxu1 %v2428_v34  ;;  %v2130_v62 = vld [vmem:[%s2336_s13 + $0x20] ss:$8 sps:$4 sm:$0xff]   ;;  %v2131_v63 = vld [vmem:[%s2336_s13 + $0x34] ss:$8 sps:$4 sm:$0xff]   ;;  %v2133_v2 = vld [vmem:[%s2336_s13 + $0x30] ss:$8 sps:$4 sm:$0xff]  }
  0x1d   : > { %707 = vmatprep.subr.bf16.mxu0 %v2092_v12  ;;  %v2184_v0 = vld [vmem:[%s2796_s3 + $0xc0] ss:$8 sps:$4 sm:$0xff]   ;;  %v2185_v1 = vld [vmem:[%s2796_s3 + $0xd4] ss:$8 sps:$4 sm:$0xff]   ;;  %v2134_v3 = vld [vmem:[%s2336_s13 + $0x44] ss:$8 sps:$4 sm:$0xff]  }
  0x1e   : > { %v2136_v4 = vld [vmem:[%s2336_s13 + $0x40] ss:$8 sps:$4 sm:$0xff]   ;;  %v2137_v5 = vld [vmem:[%s2336_s13 + $0x54] ss:$8 sps:$4 sm:$0xff]   ;;  %v2139_v6 = vld [vmem:[%s2336_s13 + $0x50] ss:$8 sps:$4 sm:$0xff]  }
  0x1f   : > { %1213 = vmatpush1.bf16.msra.mxu1 %v2440_v37  ;;  %v2140_v7 = vld [vmem:[%s2336_s13 + $0x64] ss:$8 sps:$4 sm:$0xff]   ;;  %v2142_v8 = vld [vmem:[%s2336_s13 + $0x60] ss:$8 sps:$4 sm:$0xff]   ;;  %v2143_v9 = vld [vmem:[%s2336_s13 + $0x74] ss:$8 sps:$4 sm:$0xff]  }
  0x20   : > { %708 = vmatpush1.bf16.msra.mxu0 %v2094_v14  ;;  %1214 = vmatprep.subr.bf16.mxu1 %v2446_v38  ;;  %v2145_v10 = vld [vmem:[%s2336_s13 + $0x70] ss:$8 sps:$4 sm:$0xff]   ;;  %v2188_v12 = vld [vmem:[%s2796_s3 + $0xe4] ss:$8 sps:$4 sm:$0xff]   ;;  %v2190_v13 = vld [vmem:[%s2796_s3 + $0xe0] ss:$8 sps:$4 sm:$0xff]  }
  0x21   : > { %709 = vmatprep.subr.bf16.mxu0 %v2095_v15  ;;  %v2187_v11 = vld [vmem:[%s2796_s3 + $0xd0] ss:$8 sps:$4 sm:$0xff]   ;;  %v2191_v14 = vld [vmem:[%s2796_s3 + $0xf4] ss:$8 sps:$4 sm:$0xff]  }
  0x22   : > { %v2193_v15 = vld [vmem:[%s2796_s3 + $0xf0] ss:$8 sps:$4 sm:$0xff]  }
  0x23   : > { %1215 = vmatpush1.bf16.msra.mxu1 %v2454_v40 }
  0x24   : > { %710 = vmatpush1.bf16.msra.mxu0 %v2097_v16  ;;  %1216 = vmatprep.subr.bf16.mxu1 %v2462_v42  ;;  %v943_v16 = vlaneseq }
  0x25   : > { %711 = vmatprep.subr.bf16.mxu0 %v2098_v17 }
  0x26   : > { %v2570_v17 = vshrl.u32 %v943_v16, 7 }
  0x27   : > { %1217 = vmatpush1.bf16.msra.mxu1 %v2472_v44 }
  0x28   : > { %712 = vmatpush1.bf16.msra.mxu0 %v2100_v18  ;;  %1218 = vmatprep.subr.bf16.mxu1 %v2480_v46  ;;  %v945_v18 = vsub.s32 0, %v2570_v17 }
  0x29   : > { %713 = vmatprep.subr.bf16.mxu0 %v2101_v19  ;;  %v875_v19 = vld [vmem:[%s2795_s2] sm:$0x3] }
  0x2b   : > { %1219 = vmatpush1.bf16.msra.mxu1 %v2169_v48 }
  0x2c   : > { %714 = vmatpush1.bf16.msra.mxu0 %v2103_v22  ;;  %1220 = vmatprep.subr.bf16.mxu1 %v2170_v49 }
  0x2d   : > { %715 = vmatprep.subr.bf16.mxu0 %v2104_v24 }
  0x2f   : > { %1221 = vmatpush1.bf16.msra.mxu1 %v2172_v52 }
  0x30   : > { %716 = vmatpush1.bf16.msra.mxu0 %v2106_v27  ;;  %1222 = vmatprep.subr.bf16.mxu1 %v2173_v53 }
  0x31   : > { %717 = vmatprep.subr.bf16.mxu0 %v2107_v28 }
  0x33   : > { %1223 = vmatpush1.bf16.msra.mxu1 %v2175_v54 }
  0x34   : > { %718 = vmatpush1.bf16.msra.mxu0 %v2109_v31  ;;  %1224 = vmatprep.subr.bf16.mxu1 %v2176_v55 }
  0x35   : > { %719 = vmatprep.subr.bf16.mxu0 %v2110_v32 }
  0x37   : > { %1225 = vmatpush1.bf16.msra.mxu1 %v2178_v58 }
  0x38   : > { %720 = vmatpush1.bf16.msra.mxu0 %v2112_v35  ;;  %1226 = vmatprep.subr.bf16.mxu1 %v2179_v59 }
  0x39   : > { %721 = vmatprep.subr.bf16.mxu0 %v2113_v36 }
  0x3b   : > { %1227 = vmatpush1.bf16.msra.mxu1 %v2181_v60 }
  0x3c   : > { %722 = vmatpush1.bf16.msra.mxu0 %v2115_v39  ;;  %1228 = vmatprep.subr.bf16.mxu1 %v2182_v61 }
  0x3d   : > { %723 = vmatprep.subr.bf16.mxu0 %v2116_v41 }
  0x3f   : > { %1229 = vmatpush1.bf16.msra.mxu1 %v2184_v0 }
  0x40   : > { %724 = vmatpush1.bf16.msra.mxu0 %v2118_v43  ;;  %1230 = vmatprep.subr.bf16.mxu1 %v2185_v1 }
  0x41   : > { %725 = vmatprep.subr.bf16.mxu0 %v2119_v45 }
  0x43   : > { %1231 = vmatpush1.bf16.msra.mxu1 %v2187_v11 }
  0x44   : > { %726 = vmatpush1.bf16.msra.mxu0 %v2121_v47  ;;  %1232 = vmatprep.subr.bf16.mxu1 %v2188_v12 }
  0x45   : > { %1365 = vmatprep.subr.bf16.mxu0 %v2363_v20  ;;  %v949_v20 = vsub.s32 1, %v2570_v17 }
  0x47   : > { %728 = vmatmul.mubr.bf16.vlgmr.msra.gmra.mrb[0].mxu0 %v2122_v50  ;;  %1233 = vmatpush1.bf16.msra.mxu1 %v2190_v13  ;;  %v2583_v22 = vrot.slane %v875_v19, %v949_v20 }
  0x48   : > { %737 = vmatprep.mubr.bf16.mxu0 %v2125_v51  ;;  %1366 = vmatpush1.bf16.msra.mxu0 %v2368_v21  ;;  %v2579_v21 = vrot.slane %v875_v19, %v945_v18 }
  0x49   : > { %1367 = vmatprep.subr.bf16.mxu0 %v2377_v23  ;;  %1234 = vmatprep.subr.bf16.mxu1 %v2191_v14 }
  0x4b   : > { %1235 = vmatpush1.bf16.msra.mxu1 %v2193_v15 }
  0x4c   : > { %1368 = vmatpush1.bf16.msra.mxu0 %v2386_v25 }
  0x4d   : > { %1369 = vmatprep.subr.bf16.mxu0 %v2392_v26 }
  0x4f   : > { %738 = vmatmul.mubr.bf16.gmra.mrb[4].mxu0 %v2127_v56 }
  0x50   : > { %747 = vmatprep.mubr.bf16.mxu0 %v2128_v57  ;;  %1370 = vmatpush1.bf16.msra.mxu0 %v2404_v29 }
  0x51   : > { %1371 = vmatprep.subr.bf16.mxu0 %v2410_v30 }
  0x54   : > { %1372 = vmatpush1.bf16.msra.mxu0 %v2422_v33 }
  0x55   : > { %1373 = vmatprep.subr.bf16.mxu0 %v2428_v34 }
  0x57   : > { %748 = vmatmul.mubr.bf16.gmra.mrb[8].mxu0 %v2130_v62 }
  0x58   : > { %757 = vmatprep.mubr.bf16.mxu0 %v2131_v63  ;;  %1374 = vmatpush1.bf16.msra.mxu0 %v2440_v37 }
  0x59   : > { %1375 = vmatprep.subr.bf16.mxu0 %v2446_v38 }
  0x5c   : > { %1376 = vmatpush1.bf16.msra.mxu0 %v2454_v40 }
  0x5d   : > { %1377 = vmatprep.subr.bf16.mxu0 %v2462_v42 }
  0x5f   : > { %758 = vmatmul.mubr.bf16.gmra.mrb[12].mxu0 %v2133_v2 }
  0x60   : > { %767 = vmatprep.mubr.bf16.mxu0 %v2134_v3  ;;  %1378 = vmatpush1.bf16.msra.mxu0 %v2472_v44 }
  0x61   : > { %1379 = vmatprep.subr.bf16.mxu0 %v2480_v46 }
  0x64   : > { %1380 = vmatpush1.bf16.msra.mxu0 %v2169_v48 }
  0x65   : > { %1381 = vmatprep.subr.bf16.mxu0 %v2170_v49 }
  0x67   : > { %768 = vmatmul.mubr.bf16.gmra.mrb[16].mxu0 %v2136_v4 }
  0x68   : > { %777 = vmatprep.mubr.bf16.mxu0 %v2137_v5  ;;  %1382 = vmatpush1.bf16.msra.mxu0 %v2172_v52 }
  0x69   : > { %1383 = vmatprep.subr.bf16.mxu0 %v2173_v53 }
  0x6c   : > { %1384 = vmatpush1.bf16.msra.mxu0 %v2175_v54 }
  0x6d   : > { %1385 = vmatprep.subr.bf16.mxu0 %v2176_v55 }
  0x6f   : > { %778 = vmatmul.mubr.bf16.gmra.mrb[20].mxu0 %v2139_v6 }
  0x70   : > { %787 = vmatprep.mubr.bf16.mxu0 %v2140_v7  ;;  %1386 = vmatpush1.bf16.msra.mxu0 %v2178_v58 }
  0x71   : > { %1387 = vmatprep.subr.bf16.mxu0 %v2179_v59 }
  0x74   : > { %1388 = vmatpush1.bf16.msra.mxu0 %v2181_v60 }
  0x75   : > { %1389 = vmatprep.subr.bf16.mxu0 %v2182_v61 }
  0x77   : > { %788 = vmatmul.mubr.bf16.gmra.mrb[24].mxu0 %v2142_v8 }
  0x78   : > { %797 = vmatprep.mubr.bf16.mxu0 %v2143_v9  ;;  %1390 = vmatpush1.bf16.msra.mxu0 %v2184_v0 }
  0x79   : > { %1391 = vmatprep.subr.bf16.mxu0 %v2185_v1 }
  0x7c   : > { %1392 = vmatpush1.bf16.msra.mxu0 %v2187_v11 }
  0x7d   : > { %1393 = vmatprep.subr.bf16.mxu0 %v2188_v12 }
  0x7f   : > { %798 = vmatmul.mubr.bf16.gmra.mrb[28].mxu0 %v2145_v10 }
  0x80   : > { %1394 = vmatpush1.bf16.msra.mxu0 %v2190_v13 }
  0x81   : > { %1395 = vmatprep.subr.bf16.mxu0 %v2191_v14 }
  0x84   : > { %1396 = vmatpush1.bf16.msra.mxu0 %v2193_v15 }
 0x11a   : > { %v729_v23 = vpop.f32.mrb[0].mxu0 }
 0x11b   : > { %v953_v24 = vadd.f32 %v2579_v21, %v729_v23  ;;  %v731_v25 = vpop.f32.mrb[1].mxu0 }
 0x11c   : > { %v954_v26 = vadd.f32 %v2583_v22, %v731_v25  ;;  %v733_v27 = vpop.f32.mrb[2].mxu0 }
 0x11d   : > { %v955_v28 = vadd.f32 %v2579_v21, %v733_v27  ;;  %v735_v29 = vpop.f32.mrb[3].mxu0  ;;  %v985_v31 = vmax.f32 %v953_v24, 0.0 }
 0x11e   : > { %v956_v30 = vadd.f32 %v2583_v22, %v735_v29  ;;  %v986_v33 = vmax.f32 %v954_v26, 0.0 }
 0x11f   : > { %v987_v32 = vmax.f32 %v955_v28, 0.0 }
 0x120   : > { %v988_v34 = vmax.f32 %v956_v30, 0.0 }
 0x121   : > { %v1017_v35 = vpack.c.bf16 %v987_v32, %v985_v31 }
 0x122   : > { %v739_v36 = vpop.f32.mrb[4].mxu0  ;;  %v1018_v37 = vpack.c.bf16 %v988_v34, %v986_v33 }
 0x123   : > { %v957_v38 = vadd.f32 %v2579_v21, %v739_v36  ;;  %v741_v39 = vpop.f32.mrb[5].mxu0 }
 0x124   : > { %v958_v40 = vadd.f32 %v2583_v22, %v741_v39  ;;  %v743_v41 = vpop.f32.mrb[6].mxu0  ;;  %1236 = vmatprep.mubr.bf16.mxu1 %v1018_v37 }
 0x125   : > { %v959_v42 = vadd.f32 %v2579_v21, %v743_v41  ;;  %v745_v43 = vpop.f32.mrb[7].mxu0  ;;  %1237 = vmatmul.mubr.bf16.vlgmr.msra.gmra.mrb[0].mxu1 %v1017_v35  ;;  %v989_v45 = vmax.f32 %v957_v38, 0.0 }
 0x126   : > { %v960_v44 = vadd.f32 %v2583_v22, %v745_v43  ;;  %v990_v47 = vmax.f32 %v958_v40, 0.0 }
 0x127   : > { %v991_v46 = vmax.f32 %v959_v42, 0.0 }
 0x128   : > { %v992_v48 = vmax.f32 %v960_v44, 0.0 }
 0x129   : > { %v1019_v49 = vpack.c.bf16 %v991_v46, %v989_v45 }
 0x12a   : > { %v1020_v50 = vpack.c.bf16 %v992_v48, %v990_v47  ;;  %v749_v51 = vpop.f32.mrb[8].mxu0 }
 0x12b   : > { %v961_v52 = vadd.f32 %v2579_v21, %v749_v51  ;;  %v751_v53 = vpop.f32.mrb[9].mxu0 }
 0x12c   : > { %v962_v54 = vadd.f32 %v2583_v22, %v751_v53  ;;  %v753_v55 = vpop.f32.mrb[10].mxu0  ;;  %1246 = vmatprep.mubr.bf16.mxu1 %v1020_v50 }
 0x12d   : > { %v963_v56 = vadd.f32 %v2579_v21, %v753_v55  ;;  %v755_v57 = vpop.f32.mrb[11].mxu0  ;;  %1247 = vmatmul.mubr.bf16.gmra.mrb[4].mxu1 %v1019_v49  ;;  %v993_v59 = vmax.f32 %v961_v52, 0.0 }
 0x12e   : > { %v964_v58 = vadd.f32 %v2583_v22, %v755_v57  ;;  %v994_v61 = vmax.f32 %v962_v54, 0.0 }
 0x12f   : > { %v995_v60 = vmax.f32 %v963_v56, 0.0 }
 0x130   : > { %v996_v62 = vmax.f32 %v964_v58, 0.0 }
 0x131   : > { %v1021_v63 = vpack.c.bf16 %v995_v60, %v993_v59 }
 0x132   : > { %v1022_v0 = vpack.c.bf16 %v996_v62, %v994_v61  ;;  %v759_v1 = vpop.f32.mrb[12].mxu0 }
 0x133   : > { %v965_v2 = vadd.f32 %v2579_v21, %v759_v1  ;;  %v761_v3 = vpop.f32.mrb[13].mxu0 }
 0x134   : > { %v966_v4 = vadd.f32 %v2583_v22, %v761_v3  ;;  %v763_v5 = vpop.f32.mrb[14].mxu0  ;;  %1256 = vmatprep.mubr.bf16.mxu1 %v1022_v0 }
 0x135   : > { %v967_v6 = vadd.f32 %v2579_v21, %v763_v5  ;;  %v765_v7 = vpop.f32.mrb[15].mxu0  ;;  %1257 = vmatmul.mubr.bf16.gmra.mrb[8].mxu1 %v1021_v63  ;;  %v997_v9 = vmax.f32 %v965_v2, 0.0 }
 0x136   : > { %v968_v8 = vadd.f32 %v2583_v22, %v765_v7  ;;  %v998_v11 = vmax.f32 %v966_v4, 0.0 }
 0x137   : > { %v999_v10 = vmax.f32 %v967_v6, 0.0 }
 0x138   : > { %v1000_v12 = vmax.f32 %v968_v8, 0.0 }
 0x139   : > { %v1023_v13 = vpack.c.bf16 %v999_v10, %v997_v9 }
 0x13a   : > { %v1024_v14 = vpack.c.bf16 %v1000_v12, %v998_v11  ;;  %v769_v15 = vpop.f32.mrb[16].mxu0  ;;  %v2194_v12 = vld [vmem:[%s2798_s5 + $0x40] sm:$0xff]  }
 0x13b   : > { %v969_v16 = vadd.f32 %v2579_v21, %v769_v15  ;;  %v771_v19 = vpop.f32.mrb[17].mxu0  ;;  %1986 = vmatprep.subr.bf16.mxu1 %v2194_v12  ;;  %v2199_v15 = vld [vmem:[%s2798_s5 + $0x10] sm:$0xff]  }
 0x13c   : > { %v970_v23 = vadd.f32 %v2583_v22, %v771_v19  ;;  %v773_v24 = vpop.f32.mrb[18].mxu0  ;;  %1266 = vmatprep.mubr.bf16.mxu1 %v1024_v14  ;;  %v2198_v14 = vld [vmem:[%s2798_s5 + $0x50] sm:$0xff]   ;;  %v2201_v19 = vld [vmem:[%s2798_s5 + $0x18] sm:$0xff]  }
 0x13d   : > { %v971_v25 = vadd.f32 %v2579_v21, %v773_v24  ;;  %v775_v26 = vpop.f32.mrb[19].mxu0  ;;  %1267 = vmatmul.mubr.bf16.gmra.mrb[12].mxu1 %v1023_v13  ;;  %v1001_v28 = vmax.f32 %v969_v16, 0.0  ;;  %v2197_v13 = vld [vmem:[%s2798_s5 + $0x8] sm:$0xff]   ;;  %v2200_v16 = vld [vmem:[%s2798_s5 + $0x58] sm:$0xff]   ;;  %v2203_v24 = vld [vmem:[%s2798_s5 + $0x20] sm:$0xff]  }
 0x13e   : > { %v972_v27 = vadd.f32 %v2583_v22, %v775_v26  ;;  %v1002_v30 = vmax.f32 %v970_v23, 0.0  ;;  %v2202_v23 = vld [vmem:[%s2798_s5 + $0x60] sm:$0xff]   ;;  %v2205_v26 = vld [vmem:[%s2798_s5 + $0x28] sm:$0xff]  }
 0x13f   : > { %v1003_v29 = vmax.f32 %v971_v25, 0.0  ;;  %v2204_v25 = vld [vmem:[%s2798_s5 + $0x68] sm:$0xff]  }
 0x140   : > { %v1004_v31 = vmax.f32 %v972_v27, 0.0  ;;  %v2206_v27 = vld [vmem:[%s2798_s5 + $0x70] sm:$0xff]  }
 0x141   : > { %v1025_v32 = vpack.c.bf16 %v1003_v29, %v1001_v28  ;;  %v2207_v28 = vld [vmem:[%s2798_s5 + $0x30] sm:$0xff]   ;;  %v876_v29 = vld [vmem:[%s2797_s4] sm:$0x3] }
 0x142   : > { %v1026_v33 = vpack.c.bf16 %v1004_v31, %v1002_v30  ;;  %v779_v34 = vpop.f32.mrb[20].mxu0  ;;  %v2664_v30 = vrot.slane %v876_v29, %v945_v18  ;;  %v2668_v31 = vrot.slane %v876_v29, %v949_v20 }
 0x143   : > { %v973_v35 = vadd.f32 %v2579_v21, %v779_v34  ;;  %v781_v36 = vpop.f32.mrb[21].mxu0 }
 0x144   : > { %v974_v37 = vadd.f32 %v2583_v22, %v781_v36  ;;  %v783_v38 = vpop.f32.mrb[22].mxu0  ;;  %1276 = vmatprep.mubr.bf16.mxu1 %v1026_v33 }
 0x145   : > { %v975_v39 = vadd.f32 %v2579_v21, %v783_v38  ;;  %v785_v40 = vpop.f32.mrb[23].mxu0  ;;  %1277 = vmatmul.mubr.bf16.gmra.mrb[16].mxu1 %v1025_v32  ;;  %v1005_v42 = vmax.f32 %v973_v35, 0.0 }
 0x146   : > { %v976_v41 = vadd.f32 %v2583_v22, %v785_v40  ;;  %v1006_v44 = vmax.f32 %v974_v37, 0.0 }
 0x147   : > { %v1007_v43 = vmax.f32 %v975_v39, 0.0 }
 0x148   : > { %v1008_v45 = vmax.f32 %v976_v41, 0.0 }
 0x149   : > { %v1027_v46 = vpack.c.bf16 %v1007_v43, %v1005_v42 }
 0x14a   : > { %v1028_v47 = vpack.c.bf16 %v1008_v45, %v1006_v44  ;;  %v789_v48 = vpop.f32.mrb[24].mxu0 }
 0x14b   : > { %v977_v49 = vadd.f32 %v2579_v21, %v789_v48  ;;  %v791_v50 = vpop.f32.mrb[25].mxu0 }
 0x14c   : > { %v978_v51 = vadd.f32 %v2583_v22, %v791_v50  ;;  %v793_v52 = vpop.f32.mrb[26].mxu0  ;;  %1286 = vmatprep.mubr.bf16.mxu1 %v1028_v47 }
 0x14d   : > { %v979_v53 = vadd.f32 %v2579_v21, %v793_v52  ;;  %v795_v54 = vpop.f32.mrb[27].mxu0  ;;  %1287 = vmatmul.mubr.bf16.gmra.mrb[20].mxu1 %v1027_v46  ;;  %v1009_v56 = vmax.f32 %v977_v49, 0.0 }
 0x14e   : > { %v980_v55 = vadd.f32 %v2583_v22, %v795_v54  ;;  %v1010_v58 = vmax.f32 %v978_v51, 0.0 }
 0x14f   : > { %v1011_v57 = vmax.f32 %v979_v53, 0.0 }
 0x150   : > { %v1012_v59 = vmax.f32 %v980_v55, 0.0 }
 0x151   : > { %v1029_v60 = vpack.c.bf16 %v1011_v57, %v1009_v56 }
 0x152   : > { %v1030_v61 = vpack.c.bf16 %v1012_v59, %v1010_v58  ;;  %v799_v62 = vpop.f32.mrb[28].mxu0 }
 0x153   : > { %v981_v63 = vadd.f32 %v2579_v21, %v799_v62  ;;  %v801_v0 = vpop.f32.mrb[29].mxu0 }
 0x154   : > { %v982_v1 = vadd.f32 %v2583_v22, %v801_v0  ;;  %v803_v2 = vpop.f32.mrb[30].mxu0  ;;  %1296 = vmatprep.mubr.bf16.mxu1 %v1030_v61 }
 0x155   : > { %v983_v3 = vadd.f32 %v2579_v21, %v803_v2  ;;  %v805_v4 = vpop.f32.mrb[31].mxu0  ;;  %1297 = vmatmul.mubr.bf16.gmra.mrb[24].mxu1 %v1029_v60  ;;  %v1013_v6 = vmax.f32 %v981_v63, 0.0  ;;  %v2195_v21 = vld [vmem:[%s2798_s5] sm:$0xff]  }
 0x156   : > { %v984_v5 = vadd.f32 %v2583_v22, %v805_v4  ;;  %v1014_v8 = vmax.f32 %v982_v1, 0.0  ;;  %v2196_v22 = vld [vmem:[%s2798_s5 + $0x48] sm:$0xff]   ;;  %1987 = vmatpush3.bf16.msra.mxu1 %v2195_v21 }
 0x157   : > { %v1015_v7 = vmax.f32 %v983_v3, 0.0  ;;  %1988 = vmatprep.subr.bf16.mxu1 %v2196_v22 }
 0x158   : > { %v1016_v9 = vmax.f32 %v984_v5, 0.0 }
 0x159   : > { %v1031_v10 = vpack.c.bf16 %v1015_v7, %v1013_v6 }
 0x15a   : > { %v1032_v11 = vpack.c.bf16 %v1016_v9, %v1014_v8  ;;  %1989 = vmatpush3.bf16.msra.mxu1 %v2197_v13 }
 0x15b   : > { %1990 = vmatprep.subr.bf16.mxu1 %v2198_v14 }
 0x15c   : > { %1306 = vmatprep.mubr.bf16.mxu1 %v1032_v11 }
 0x15d   : > { %1307 = vmatmul.mubr.bf16.gmra.mrb[28].mxu1 %v1031_v10 }
 0x15e   : > { %1991 = vmatpush3.bf16.msra.mxu1 %v2199_v15 }
 0x15f   : > { %1992 = vmatprep.subr.bf16.mxu1 %v2200_v16 }
 0x162   : > { %1993 = vmatpush3.bf16.msra.mxu1 %v2201_v19 }
 0x163   : > { %1994 = vmatprep.subr.bf16.mxu1 %v2202_v23 }
 0x166   : > { %1995 = vmatpush3.bf16.msra.mxu1 %v2203_v24 }
 0x167   : > { %1996 = vmatprep.subr.bf16.mxu1 %v2204_v25 }
 0x16a   : > { %1997 = vmatpush3.bf16.msra.mxu1 %v2205_v26 }
 0x16b   : > { %1998 = vmatprep.subr.bf16.mxu1 %v2206_v27 }
 0x16e   : > { %1999 = vmatpush3.bf16.msra.mxu1 %v2207_v28 }
 0x1f8   : > { %v1238_v32 = vpop.f32.mrb[0].mxu1 }
 0x1f9   : > { %v1239_v33 = vadd.f32 %v1238_v32, %v2664_v30  ;;  %v1240_v34 = vpop.f32.mrb[1].mxu1 }
 0x1fa   : > { %v1241_v35 = vadd.f32 %v1240_v34, %v2668_v31  ;;  %v1242_v36 = vpop.f32.mrb[2].mxu1 }
 0x1fb   : > { %v1243_v37 = vadd.f32 %v1242_v36, %v2664_v30  ;;  %v1244_v38 = vpop.f32.mrb[3].mxu1  ;;  %v1317_v40 = vmax.f32 %v1239_v33, 0.0 }
 0x1fc   : > { %v1245_v39 = vadd.f32 %v1244_v38, %v2668_v31  ;;  %v1318_v18 = vmax.f32 %v1241_v35, 0.0 }
 0x1fd   : > { %v1319_v41 = vmax.f32 %v1243_v37, 0.0 }
 0x1fe   : > { %v1320_v42 = vmax.f32 %v1245_v39, 0.0 }
 0x1ff   : > { %v1349_v43 = vpack.c.bf16 %v1319_v41, %v1317_v40 }
 0x200   : > { %v1350_v17 = vpack.c.bf16 %v1320_v42, %v1318_v18  ;;  %v1248_v20 = vpop.f32.mrb[4].mxu1 }
 0x201   : > { %v1249_v44 = vadd.f32 %v1248_v20, %v2664_v30  ;;  %v1250_v45 = vpop.f32.mrb[5].mxu1 }
 0x202   : > { %v1251_v46 = vadd.f32 %v1250_v45, %v2668_v31  ;;  %v1252_v47 = vpop.f32.mrb[6].mxu1  ;;  %1397 = vmatprep.mubr.bf16.mxu0 %v1350_v17 }
 0x203   : > { %v1253_v48 = vadd.f32 %v1252_v47, %v2664_v30  ;;  %v1254_v49 = vpop.f32.mrb[7].mxu1  ;;  %1398 = vmatmul.mubr.bf16.vlgmr.msra.gmra.mrb[32].mxu0 %v1349_v43  ;;  %v1321_v51 = vmax.f32 %v1249_v44, 0.0 }
 0x204   : > { %v1255_v50 = vadd.f32 %v1254_v49, %v2668_v31  ;;  %v1322_v53 = vmax.f32 %v1251_v46, 0.0 }
 0x205   : > { %v1323_v52 = vmax.f32 %v1253_v48, 0.0 }
 0x206   : > { %v1324_v54 = vmax.f32 %v1255_v50, 0.0 }
 0x207   : > { %v1351_v55 = vpack.c.bf16 %v1323_v52, %v1321_v51 }
 0x208   : > { %v1352_v56 = vpack.c.bf16 %v1324_v54, %v1322_v53  ;;  %v1258_v57 = vpop.f32.mrb[8].mxu1 }
 0x209   : > { %v1259_v58 = vadd.f32 %v1258_v57, %v2664_v30  ;;  %v1260_v59 = vpop.f32.mrb[9].mxu1 }
 0x20a   : > { %v1261_v60 = vadd.f32 %v1260_v59, %v2668_v31  ;;  %v1262_v61 = vpop.f32.mrb[10].mxu1  ;;  %1407 = vmatprep.mubr.bf16.mxu0 %v1352_v56 }
 0x20b   : > { %v1263_v62 = vadd.f32 %v1262_v61, %v2664_v30  ;;  %v1264_v63 = vpop.f32.mrb[11].mxu1  ;;  %1408 = vmatmul.mubr.bf16.gmra.mrb[36].mxu0 %v1351_v55  ;;  %v1325_v1 = vmax.f32 %v1259_v58, 0.0 }
 0x20c   : > { %v1265_v0 = vadd.f32 %v1264_v63, %v2668_v31  ;;  %v1326_v3 = vmax.f32 %v1261_v60, 0.0 }
 0x20d   : > { %v1327_v2 = vmax.f32 %v1263_v62, 0.0 }
 0x20e   : > { %v1328_v4 = vmax.f32 %v1265_v0, 0.0 }
 0x20f   : > { %v1353_v5 = vpack.c.bf16 %v1327_v2, %v1325_v1 }
 0x210   : > { %v1354_v6 = vpack.c.bf16 %v1328_v4, %v1326_v3  ;;  %v1268_v7 = vpop.f32.mrb[12].mxu1 }
 0x211   : > { %v1269_v8 = vadd.f32 %v1268_v7, %v2664_v30  ;;  %v1270_v9 = vpop.f32.mrb[13].mxu1 }
 0x212   : > { %v1271_v10 = vadd.f32 %v1270_v9, %v2668_v31  ;;  %v1272_v11 = vpop.f32.mrb[14].mxu1  ;;  %1417 = vmatprep.mubr.bf16.mxu0 %v1354_v6 }
 0x213   : > { %v1273_v12 = vadd.f32 %v1272_v11, %v2664_v30  ;;  %v1274_v21 = vpop.f32.mrb[15].mxu1  ;;  %1418 = vmatmul.mubr.bf16.gmra.mrb[40].mxu0 %v1353_v5  ;;  %v1329_v13 = vmax.f32 %v1269_v8, 0.0 }
 0x214   : > { %v1275_v22 = vadd.f32 %v1274_v21, %v2668_v31  ;;  %v1330_v15 = vmax.f32 %v1271_v10, 0.0 }
 0x215   : > { %v1331_v14 = vmax.f32 %v1273_v12, 0.0 }
 0x216   : > { %v1332_v16 = vmax.f32 %v1275_v22, 0.0 }
 0x217   : > { %v1355_v19 = vpack.c.bf16 %v1331_v14, %v1329_v13  ;;  %v2208_v13 = vld [vmem:[%s2798_s5 + $0x78] sm:$0xff]  }
 0x218   : > { %v1356_v23 = vpack.c.bf16 %v1332_v16, %v1330_v15  ;;  %v1278_v24 = vpop.f32.mrb[16].mxu1  ;;  %v2209_v14 = vld [vmem:[%s2798_s5 + $0x38] sm:$0xff]   ;;  %2000 = vmatprep.subr.bf16.mxu1 %v2208_v13 }
 0x219   : > { %v1279_v25 = vadd.f32 %v1278_v24, %v2664_v30  ;;  %v1280_v26 = vpop.f32.mrb[17].mxu1  ;;  %2001 = vmatpush3.bf16.msra.mxu1 %v2209_v14 }
 0x21a   : > { %v1281_v27 = vadd.f32 %v1280_v26, %v2668_v31  ;;  %v1282_v28 = vpop.f32.mrb[18].mxu1  ;;  %1427 = vmatprep.mubr.bf16.mxu0 %v1356_v23 }
 0x21b   : > { %v1283_v29 = vadd.f32 %v1282_v28, %v2664_v30  ;;  %v1284_v32 = vpop.f32.mrb[19].mxu1  ;;  %1428 = vmatmul.mubr.bf16.gmra.mrb[44].mxu0 %v1355_v19  ;;  %v1333_v34 = vmax.f32 %v1279_v25, 0.0 }
 0x21c   : > { %v1285_v33 = vadd.f32 %v1284_v32, %v2668_v31  ;;  %v1334_v36 = vmax.f32 %v1281_v27, 0.0 }
 0x21d   : > { %v1335_v35 = vmax.f32 %v1283_v29, 0.0 }
 0x21e   : > { %v1336_v37 = vmax.f32 %v1285_v33, 0.0 }
 0x21f   : > { %v1357_v38 = vpack.c.bf16 %v1335_v35, %v1333_v34 }
 0x220   : > { %v1358_v39 = vpack.c.bf16 %v1336_v37, %v1334_v36  ;;  %v1288_v40 = vpop.f32.mrb[20].mxu1 }
 0x221   : > { %v1289_v41 = vadd.f32 %v1288_v40, %v2664_v30  ;;  %v1290_v18 = vpop.f32.mrb[21].mxu1 }
 0x222   : > { %v1291_v42 = vadd.f32 %v1290_v18, %v2668_v31  ;;  %v1292_v43 = vpop.f32.mrb[22].mxu1  ;;  %1437 = vmatprep.mubr.bf16.mxu0 %v1358_v39 }
 0x223   : > { %v1293_v17 = vadd.f32 %v1292_v43, %v2664_v30  ;;  %v1294_v20 = vpop.f32.mrb[23].mxu1  ;;  %1438 = vmatmul.mubr.bf16.gmra.mrb[48].mxu0 %v1357_v38  ;;  %v1337_v45 = vmax.f32 %v1289_v41, 0.0 }
 0x224   : > { %v1295_v44 = vadd.f32 %v1294_v20, %v2668_v31  ;;  %v1338_v47 = vmax.f32 %v1291_v42, 0.0 }
 0x225   : > { %v1339_v46 = vmax.f32 %v1293_v17, 0.0 }
 0x226   : > { %v1340_v48 = vmax.f32 %v1295_v44, 0.0 }
 0x227   : > { %v1359_v49 = vpack.c.bf16 %v1339_v46, %v1337_v45 }
 0x228   : > { %v1360_v50 = vpack.c.bf16 %v1340_v48, %v1338_v47  ;;  %v1298_v51 = vpop.f32.mrb[24].mxu1 }
 0x229   : > { %v1299_v52 = vadd.f32 %v1298_v51, %v2664_v30  ;;  %v1300_v53 = vpop.f32.mrb[25].mxu1 }
 0x22a   : > { %v1301_v54 = vadd.f32 %v1300_v53, %v2668_v31  ;;  %v1302_v55 = vpop.f32.mrb[26].mxu1  ;;  %1447 = vmatprep.mubr.bf16.mxu0 %v1360_v50 }
 0x22b   : > { %v1303_v56 = vadd.f32 %v1302_v55, %v2664_v30  ;;  %v1304_v57 = vpop.f32.mrb[27].mxu1  ;;  %1448 = vmatmul.mubr.bf16.gmra.mrb[52].mxu0 %v1359_v49  ;;  %v1341_v59 = vmax.f32 %v1299_v52, 0.0 }
 0x22c   : > { %v1305_v58 = vadd.f32 %v1304_v57, %v2668_v31  ;;  %v1342_v61 = vmax.f32 %v1301_v54, 0.0 }
 0x22d   : > { %v1343_v60 = vmax.f32 %v1303_v56, 0.0 }
 0x22e   : > { %v1344_v62 = vmax.f32 %v1305_v58, 0.0 }
 0x22f   : > { %v1361_v63 = vpack.c.bf16 %v1343_v60, %v1341_v59 }
 0x230   : > { %v1362_v0 = vpack.c.bf16 %v1344_v62, %v1342_v61  ;;  %v1308_v1 = vpop.f32.mrb[28].mxu1 }
 0x231   : > { %v1309_v2 = vadd.f32 %v1308_v1, %v2664_v30  ;;  %v1310_v3 = vpop.f32.mrb[29].mxu1 }
 0x232   : > { %v1311_v4 = vadd.f32 %v1310_v3, %v2668_v31  ;;  %v1312_v5 = vpop.f32.mrb[30].mxu1  ;;  %1457 = vmatprep.mubr.bf16.mxu0 %v1362_v0 }
 0x233   : > { %v1313_v6 = vadd.f32 %v1312_v5, %v2664_v30  ;;  %v1314_v7 = vpop.f32.mrb[31].mxu1  ;;  %1458 = vmatmul.mubr.bf16.gmra.mrb[56].mxu0 %v1361_v63  ;;  %v1345_v9 = vmax.f32 %v1309_v2, 0.0 }
 0x234   : > { %v1315_v8 = vadd.f32 %v1314_v7, %v2668_v31  ;;  %v1346_v11 = vmax.f32 %v1311_v4, 0.0 }
 0x235   : > { %v1347_v10 = vmax.f32 %v1313_v6, 0.0 }
 0x236   : > { %v1348_v12 = vmax.f32 %v1315_v8, 0.0 }
 0x237   : > { %v1363_v21 = vpack.c.bf16 %v1347_v10, %v1345_v9 }
 0x238   : > { %v1364_v22 = vpack.c.bf16 %v1348_v12, %v1346_v11 }
 0x23a   : > { %1467 = vmatprep.mubr.bf16.mxu0 %v1364_v22 }
 0x23b   : > { %1468 = vmatmul.mubr.bf16.gmra.mrb[60].mxu0 %v1363_v21 }
 0x2d6   : > { %v1399_v15 = vpop.f32.mrb[32].mxu0 }
 0x2d7   : > { %v1400_v16 = vadd.f32 %v1399_v15, %v2664_v30  ;;  %v1401_v19 = vpop.f32.mrb[33].mxu0 }
 0x2d8   : > { %v1402_v23 = vadd.f32 %v1401_v19, %v2668_v31  ;;  %v1403_v24 = vpop.f32.mrb[34].mxu0 }
 0x2d9   : > { %v1404_v25 = vadd.f32 %v1403_v24, %v2664_v30  ;;  %v1405_v26 = vpop.f32.mrb[35].mxu0  ;;  %v1478_v28 = vmax.f32 %v1400_v16, 0.0 }
 0x2da   : > { %v1406_v27 = vadd.f32 %v1405_v26, %v2668_v31  ;;  %v1479_v32 = vmax.f32 %v1402_v23, 0.0 }
 0x2db   : > { %v1480_v29 = vmax.f32 %v1404_v25, 0.0 }
 0x2dc   : > { %v1481_v33 = vmax.f32 %v1406_v27, 0.0 }
 0x2dd   : > { %v1510_v34 = vpack.c.bf16 %v1480_v29, %v1478_v28 }
 0x2de   : > { %v1511_v35 = vpack.c.bf16 %v1481_v33, %v1479_v32  ;;  %v1409_v36 = vpop.f32.mrb[36].mxu0 }
 0x2df   : > { %v1410_v37 = vadd.f32 %v1409_v36, %v2664_v30  ;;  %v1411_v38 = vpop.f32.mrb[37].mxu0 }
 0x2e0   : > { %v1412_v39 = vadd.f32 %v1411_v38, %v2668_v31  ;;  %v1413_v40 = vpop.f32.mrb[38].mxu0  ;;  %1692 = vmatprep.mubr.bf16.mxu1 %v1511_v35 }
 0x2e1   : > { %v1414_v41 = vadd.f32 %v1413_v40, %v2664_v30  ;;  %v1415_v18 = vpop.f32.mrb[39].mxu0  ;;  %1693 = vmatmul.mubr.bf16.vlgmr.msra.gmra.mrb[32].mxu1 %v1510_v34  ;;  %v1482_v43 = vmax.f32 %v1410_v37, 0.0 }
 0x2e2   : > { %v1416_v42 = vadd.f32 %v1415_v18, %v2668_v31  ;;  %v1483_v20 = vmax.f32 %v1412_v39, 0.0 }
 0x2e3   : > { %v1484_v17 = vmax.f32 %v1414_v41, 0.0 }
 0x2e4   : > { %v1485_v44 = vmax.f32 %v1416_v42, 0.0 }
 0x2e5   : > { %v1512_v45 = vpack.c.bf16 %v1484_v17, %v1482_v43 }
 0x2e6   : > { %v1513_v46 = vpack.c.bf16 %v1485_v44, %v1483_v20  ;;  %v1419_v47 = vpop.f32.mrb[40].mxu0 }
 0x2e7   : > { %v1420_v48 = vadd.f32 %v1419_v47, %v2664_v30  ;;  %v1421_v49 = vpop.f32.mrb[41].mxu0 }
 0x2e8   : > { %v1422_v50 = vadd.f32 %v1421_v49, %v2668_v31  ;;  %v1423_v51 = vpop.f32.mrb[42].mxu0  ;;  %1700 = vmatprep.mubr.bf16.mxu1 %v1513_v46 }
 0x2e9   : > { %v1424_v52 = vadd.f32 %v1423_v51, %v2664_v30  ;;  %v1425_v53 = vpop.f32.mrb[43].mxu0  ;;  %1701 = vmatmul.mubr.bf16.gmra.mrb[36].mxu1 %v1512_v45  ;;  %v1486_v55 = vmax.f32 %v1420_v48, 0.0 }
 0x2ea   : > { %v1426_v54 = vadd.f32 %v1425_v53, %v2668_v31  ;;  %v1487_v57 = vmax.f32 %v1422_v50, 0.0 }
 0x2eb   : > { %v1488_v56 = vmax.f32 %v1424_v52, 0.0 }
 0x2ec   : > { %v1489_v58 = vmax.f32 %v1426_v54, 0.0 }
 0x2ed   : > { %v1514_v59 = vpack.c.bf16 %v1488_v56, %v1486_v55 }
 0x2ee   : > { %v1515_v60 = vpack.c.bf16 %v1489_v58, %v1487_v57  ;;  %v1429_v61 = vpop.f32.mrb[44].mxu0 }
 0x2ef   : > { %v1430_v62 = vadd.f32 %v1429_v61, %v2664_v30  ;;  %v1431_v63 = vpop.f32.mrb[45].mxu0 }
 0x2f0   : > { %v1432_v0 = vadd.f32 %v1431_v63, %v2668_v31  ;;  %v1433_v1 = vpop.f32.mrb[46].mxu0  ;;  %1708 = vmatprep.mubr.bf16.mxu1 %v1515_v60 }
 0x2f1   : > { %v1434_v2 = vadd.f32 %v1433_v1, %v2664_v30  ;;  %v1435_v3 = vpop.f32.mrb[47].mxu0  ;;  %1709 = vmatmul.mubr.bf16.gmra.mrb[40].mxu1 %v1514_v59  ;;  %v1490_v5 = vmax.f32 %v1430_v62, 0.0 }
 0x2f2   : > { %v1436_v4 = vadd.f32 %v1435_v3, %v2668_v31  ;;  %v1491_v7 = vmax.f32 %v1432_v0, 0.0 }
 0x2f3   : > { %v1492_v6 = vmax.f32 %v1434_v2, 0.0 }
 0x2f4   : > { %v1493_v8 = vmax.f32 %v1436_v4, 0.0 }
 0x2f5   : > { %v1516_v9 = vpack.c.bf16 %v1492_v6, %v1490_v5  ;;  %v2743_v6 = vld [vmem:[%s2799_s6] ss:$0 sm:$0xff] }
 0x2f6   : > { %v1517_v10 = vpack.c.bf16 %v1493_v8, %v1491_v7  ;;  %v1439_v11 = vpop.f32.mrb[48].mxu0 }
 0x2f7   : > { %v1440_v12 = vadd.f32 %v1439_v11, %v2664_v30  ;;  %v1441_v21 = vpop.f32.mrb[49].mxu0 }
 0x2f8   : > { %v1442_v22 = vadd.f32 %v1441_v21, %v2668_v31  ;;  %v1443_v13 = vpop.f32.mrb[50].mxu0  ;;  %1716 = vmatprep.mubr.bf16.mxu1 %v1517_v10 }
 0x2f9   : > { %v1444_v14 = vadd.f32 %v1443_v13, %v2664_v30  ;;  %v1445_v15 = vpop.f32.mrb[51].mxu0  ;;  %1717 = vmatmul.mubr.bf16.gmra.mrb[44].mxu1 %v1516_v9  ;;  %v1494_v19 = vmax.f32 %v1440_v12, 0.0 }
 0x2fa   : > { %v1446_v16 = vadd.f32 %v1445_v15, %v2668_v31  ;;  %v1495_v24 = vmax.f32 %v1442_v22, 0.0 }
 0x2fb   : > { %v1496_v23 = vmax.f32 %v1444_v14, 0.0 }
 0x2fc   : > { %v1497_v25 = vmax.f32 %v1446_v16, 0.0 }
 0x2fd   : > { %v1518_v26 = vpack.c.bf16 %v1496_v23, %v1494_v19 }
 0x2fe   : > { %v1519_v27 = vpack.c.bf16 %v1497_v25, %v1495_v24  ;;  %v1449_v28 = vpop.f32.mrb[52].mxu0 }
 0x2ff   : > { %v1450_v29 = vadd.f32 %v1449_v28, %v2664_v30  ;;  %v1451_v32 = vpop.f32.mrb[53].mxu0 }
 0x300   : > { %v1452_v33 = vadd.f32 %v1451_v32, %v2668_v31  ;;  %v1453_v34 = vpop.f32.mrb[54].mxu0  ;;  %1724 = vmatprep.mubr.bf16.mxu1 %v1519_v27 }
 0x301   : > { %v1454_v35 = vadd.f32 %v1453_v34, %v2664_v30  ;;  %v1455_v36 = vpop.f32.mrb[55].mxu0  ;;  %1725 = vmatmul.mubr.bf16.gmra.mrb[48].mxu1 %v1518_v26  ;;  %v1498_v38 = vmax.f32 %v1450_v29, 0.0 }
 0x302   : > { %v1456_v37 = vadd.f32 %v1455_v36, %v2668_v31  ;;  %v1499_v40 = vmax.f32 %v1452_v33, 0.0 }
 0x303   : > { %v1500_v39 = vmax.f32 %v1454_v35, 0.0 }
 0x304   : > { %v1501_v41 = vmax.f32 %v1456_v37, 0.0 }
 0x305   : > { %v1520_v18 = vpack.c.bf16 %v1500_v39, %v1498_v38 }
 0x306   : > { %v1521_v42 = vpack.c.bf16 %v1501_v41, %v1499_v40  ;;  %v1459_v43 = vpop.f32.mrb[56].mxu0 }
 0x307   : > { %v1460_v17 = vadd.f32 %v1459_v43, %v2664_v30  ;;  %v1461_v20 = vpop.f32.mrb[57].mxu0 }
 0x308   : > { %v1462_v44 = vadd.f32 %v1461_v20, %v2668_v31  ;;  %v1463_v45 = vpop.f32.mrb[58].mxu0  ;;  %1732 = vmatprep.mubr.bf16.mxu1 %v1521_v42 }
 0x309   : > { %v1464_v46 = vadd.f32 %v1463_v45, %v2664_v30  ;;  %v1465_v47 = vpop.f32.mrb[59].mxu0  ;;  %1733 = vmatmul.mubr.bf16.gmra.mrb[52].mxu1 %v1520_v18  ;;  %v1502_v49 = vmax.f32 %v1460_v17, 0.0 }
 0x30a   : > { %v1466_v48 = vadd.f32 %v1465_v47, %v2668_v31  ;;  %v1503_v51 = vmax.f32 %v1462_v44, 0.0 }
 0x30b   : > { %v1504_v50 = vmax.f32 %v1464_v46, 0.0 }
 0x30c   : > { %v1505_v52 = vmax.f32 %v1466_v48, 0.0 }
 0x30d   : > { %v1522_v53 = vpack.c.bf16 %v1504_v50, %v1502_v49 }
 0x30e   : > { %v1523_v54 = vpack.c.bf16 %v1505_v52, %v1503_v51  ;;  %v1469_v55 = vpop.f32.mrb[60].mxu0 }
 0x30f   : > { %v1470_v56 = vadd.f32 %v1469_v55, %v2664_v30  ;;  %v1471_v57 = vpop.f32.mrb[61].mxu0 }
 0x310   : > { %v1472_v58 = vadd.f32 %v1471_v57, %v2668_v31  ;;  %v1473_v59 = vpop.f32.mrb[62].mxu0  ;;  %1740 = vmatprep.mubr.bf16.mxu1 %v1523_v54 }
 0x311   : > { %v1474_v60 = vadd.f32 %v1473_v59, %v2664_v30  ;;  %v1475_v61 = vpop.f32.mrb[63].mxu0  ;;  %1741 = vmatmul.mubr.bf16.gmra.mrb[56].mxu1 %v1522_v53  ;;  %v1506_v63 = vmax.f32 %v1470_v56, 0.0 }
 0x312   : > { %v1476_v62 = vadd.f32 %v1475_v61, %v2668_v31  ;;  %v1507_v1 = vmax.f32 %v1472_v58, 0.0 }
 0x313   : > { %v1508_v0 = vmax.f32 %v1474_v60, 0.0 }
 0x314   : > { %v1509_v2 = vmax.f32 %v1476_v62, 0.0 }
 0x315   : > { %v1524_v3 = vpack.c.bf16 %v1508_v0, %v1506_v63 }
 0x316   : > { %v1525_v4 = vpack.c.bf16 %v1509_v2, %v1507_v1 }
 0x318   : > { %1748 = vmatprep.mubr.bf16.mxu1 %v1525_v4 }
 0x319   : > { %1749 = vmatmul.mubr.bf16.gmra.mrb[60].mxu1 %v1524_v3 }
 0x3b4   : > { %v2002_v5 = vpop.f32.mrb[32].mxu1 }
 0x3b5   : > { %v2003_v30 = vpop.f32.mrb[33].mxu1 }
 0x3b6   : > { %v2004_v7 = vadd.f32 %v2003_v30, %v2002_v5  ;;  %v2005_v8 = vpop.f32.mrb[34].mxu1 }
 0x3b7   : > { %v2006_v9 = vpop.f32.mrb[35].mxu1 }
 0x3b8   : > { %v1695_v31 = vadd.f32 %v2004_v7, %v2743_v6  ;;  %v2007_v10 = vadd.f32 %v2006_v9, %v2005_v8 }
 0x3ba   : > { %v1757_v11 = vmax.f32 %v1695_v31, 0.0  ;;  %v1698_v12 = vadd.f32 %v2007_v10, %v2743_v6 }
 0x3bc   : > { %1773 = vst [vmem:[%s2751_s20] sm:$0xff] %v1757_v11  ;;  %v1758_v21 = vmax.f32 %v1698_v12, 0.0  ;;  %v2008_v22 = vpop.f32.mrb[36].mxu1 }
 0x3bd   : > { %v2009_v13 = vpop.f32.mrb[37].mxu1 }
 0x3be   : > { %1774 = vst [vmem:[%s2751_s20 + $0x8] sm:$0xff] %v1758_v21  ;;  %v2010_v14 = vadd.f32 %v2009_v13, %v2008_v22  ;;  %v2011_v15 = vpop.f32.mrb[38].mxu1 }
 0x3bf   : > { %v2012_v16 = vpop.f32.mrb[39].mxu1 }
 0x3c0   : > { %v1703_v19 = vadd.f32 %v2010_v14, %v2743_v6  ;;  %v2013_v23 = vadd.f32 %v2012_v16, %v2011_v15 }
 0x3c2   : > { %v1759_v24 = vmax.f32 %v1703_v19, 0.0  ;;  %v1706_v25 = vadd.f32 %v2013_v23, %v2743_v6 }
 0x3c4   : > { %1775 = vst [vmem:[%s2751_s20 + $0x10] sm:$0xff] %v1759_v24  ;;  %v1760_v26 = vmax.f32 %v1706_v25, 0.0  ;;  %v2014_v27 = vpop.f32.mrb[40].mxu1 }
 0x3c5   : > { %v2015_v28 = vpop.f32.mrb[41].mxu1 }
 0x3c6   : > { %1776 = vst [vmem:[%s2751_s20 + $0x18] sm:$0xff] %v1760_v26  ;;  %v2016_v29 = vadd.f32 %v2015_v28, %v2014_v27  ;;  %v2017_v32 = vpop.f32.mrb[42].mxu1 }
 0x3c7   : > { %v2018_v33 = vpop.f32.mrb[43].mxu1 }
 0x3c8   : > { %v1711_v34 = vadd.f32 %v2016_v29, %v2743_v6  ;;  %v2019_v35 = vadd.f32 %v2018_v33, %v2017_v32 }
 0x3ca   : > { %v1761_v36 = vmax.f32 %v1711_v34, 0.0  ;;  %v1714_v37 = vadd.f32 %v2019_v35, %v2743_v6 }
 0x3cc   : > { %1777 = vst [vmem:[%s2751_s20 + $0x20] sm:$0xff] %v1761_v36  ;;  %v1762_v38 = vmax.f32 %v1714_v37, 0.0  ;;  %v2020_v39 = vpop.f32.mrb[44].mxu1 }
 0x3cd   : > { %v2021_v40 = vpop.f32.mrb[45].mxu1 }
 0x3ce   : > { %1778 = vst [vmem:[%s2751_s20 + $0x28] sm:$0xff] %v1762_v38  ;;  %v2022_v41 = vadd.f32 %v2021_v40, %v2020_v39  ;;  %v2023_v18 = vpop.f32.mrb[46].mxu1 }
 0x3cf   : > { %v2024_v42 = vpop.f32.mrb[47].mxu1 }
 0x3d0   : > { %v1719_v43 = vadd.f32 %v2022_v41, %v2743_v6  ;;  %v2025_v17 = vadd.f32 %v2024_v42, %v2023_v18 }
 0x3d2   : > { %v1763_v20 = vmax.f32 %v1719_v43, 0.0  ;;  %v1722_v44 = vadd.f32 %v2025_v17, %v2743_v6 }
 0x3d4   : > { %1779 = vst [vmem:[%s2751_s20 + $0x30] sm:$0xff] %v1763_v20  ;;  %v1764_v45 = vmax.f32 %v1722_v44, 0.0  ;;  %v2026_v46 = vpop.f32.mrb[48].mxu1 }
 0x3d5   : > { %v2027_v47 = vpop.f32.mrb[49].mxu1 }
 0x3d6   : > { %1780 = vst [vmem:[%s2751_s20 + $0x38] sm:$0xff] %v1764_v45  ;;  %v2028_v48 = vadd.f32 %v2027_v47, %v2026_v46  ;;  %v2029_v49 = vpop.f32.mrb[50].mxu1 }
 0x3d7   : > { %v2030_v50 = vpop.f32.mrb[51].mxu1 }
 0x3d8   : > { %v1727_v51 = vadd.f32 %v2028_v48, %v2743_v6  ;;  %v2031_v52 = vadd.f32 %v2030_v50, %v2029_v49 }
 0x3da   : > { %v1765_v53 = vmax.f32 %v1727_v51, 0.0  ;;  %v1730_v54 = vadd.f32 %v2031_v52, %v2743_v6 }
 0x3dc   : > { %1781 = vst [vmem:[%s2751_s20 + $0x40] sm:$0xff] %v1765_v53  ;;  %v1766_v55 = vmax.f32 %v1730_v54, 0.0  ;;  %v2032_v56 = vpop.f32.mrb[52].mxu1 }
 0x3dd   : > { %v2033_v57 = vpop.f32.mrb[53].mxu1 }
 0x3de   : > { %1782 = vst [vmem:[%s2751_s20 + $0x48] sm:$0xff] %v1766_v55  ;;  %v2034_v58 = vadd.f32 %v2033_v57, %v2032_v56  ;;  %v2035_v59 = vpop.f32.mrb[54].mxu1 }
 0x3df   : > { %v2036_v60 = vpop.f32.mrb[55].mxu1 }
 0x3e0   : > { %v1735_v61 = vadd.f32 %v2034_v58, %v2743_v6  ;;  %v2037_v62 = vadd.f32 %v2036_v60, %v2035_v59 }
 0x3e2   : > { %v1767_v63 = vmax.f32 %v1735_v61, 0.0  ;;  %v1738_v0 = vadd.f32 %v2037_v62, %v2743_v6 }
 0x3e4   : > { %1783 = vst [vmem:[%s2751_s20 + $0x50] sm:$0xff] %v1767_v63  ;;  %v1768_v1 = vmax.f32 %v1738_v0, 0.0  ;;  %v2038_v2 = vpop.f32.mrb[56].mxu1 }
 0x3e5   : > { %v2039_v3 = vpop.f32.mrb[57].mxu1 }
 0x3e6   : > { %1784 = vst [vmem:[%s2751_s20 + $0x58] sm:$0xff] %v1768_v1  ;;  %v2040_v4 = vadd.f32 %v2039_v3, %v2038_v2  ;;  %v2041_v5 = vpop.f32.mrb[58].mxu1 }
 0x3e7   : > { %v2042_v30 = vpop.f32.mrb[59].mxu1 }
 0x3e8   : > { %v1743_v7 = vadd.f32 %v2040_v4, %v2743_v6  ;;  %v2043_v8 = vadd.f32 %v2042_v30, %v2041_v5 }
 0x3ea   : > { %v1769_v9 = vmax.f32 %v1743_v7, 0.0  ;;  %v1746_v31 = vadd.f32 %v2043_v8, %v2743_v6 }
 0x3ec   : > { %1785 = vst [vmem:[%s2751_s20 + $0x60] sm:$0xff] %v1769_v9  ;;  %v1770_v10 = vmax.f32 %v1746_v31, 0.0  ;;  %v2044_v11 = vpop.f32.mrb[60].mxu1 }
 0x3ed   : > { %v2045_v12 = vpop.f32.mrb[61].mxu1 }
 0x3ee   : > { %1786 = vst [vmem:[%s2751_s20 + $0x68] sm:$0xff] %v1770_v10  ;;  %v2046_v21 = vadd.f32 %v2045_v12, %v2044_v11  ;;  %v2047_v22 = vpop.f32.mrb[62].mxu1 }
 0x3ef   : > { %v2048_v13 = vpop.f32.mrb[63].mxu1 }
 0x3f0   : > { %v1751_v14 = vadd.f32 %v2046_v21, %v2743_v6  ;;  %v2049_v15 = vadd.f32 %v2048_v13, %v2047_v22 }
 0x3f2   : > { %v1771_v16 = vmax.f32 %v1751_v14, 0.0  ;;  %v1754_v19 = vadd.f32 %v2049_v15, %v2743_v6 }
 0x3f4   : > { %1787 = vst [vmem:[%s2751_s20 + $0x70] sm:$0xff] %v1771_v16  ;;  %v1772_v23 = vmax.f32 %v1754_v19, 0.0 }
 0x3f6   : > { %1788 = vst [vmem:[%s2751_s20 + $0x78] sm:$0xff] %v1772_v23 }
 0x3f7 PF: > { %s17_s26 = sadd.s32 1, %s2232_s26   ;;  %s2801_s24 = smov %s2228_s25 }
 0x3f8   : > { %p14_p5 = scmp.ge.s32.totalorder %s17_s26, 4   ;;  %s2802_s25 = smov %s2804_s27 }
 0x3fa   :  { %16 = sbr.rel (!%p14_p5) target bundleno = 2 (0x2), region = 89 }

</bundles_post_ra>
